<compile_context>
chip_gen: v5e
topology: v5e:2x2
jax: 0.10.0
libtpu: 0.0.40
codegen_flags: <defaults>
</compile_context>

<pallas_src>
import jax
import jax.numpy as jnp
from jax.experimental import pallas as pl
from jax.experimental.pallas import tpu as pltpu

H_IN = 28          # input spatial size (1 channel)
K = 3              # conv kernel size
H1 = H_IN - K + 1  # 26 (conv1 output)
H2 = H1 - K + 1    # 24 (conv2 output)
N_CLASSES = 10
FLAT = H2 * H2     # 576 (matches Linear(576, 10))


# ---------------------------------------------------------------------------
# Fused kernel: one image per grid step, everything resident in VMEM/SMEM.
# ---------------------------------------------------------------------------
def _fused_forward_kernel(x_ref, w1_ref, b1_ref, w2_ref, b2_ref,
                          a_ref, mask_ref, gsel_ref, bf_ref,
                          o_ref, y1_ref):
    # ---- conv1 (1 -> 3 channels, 3x3 valid) + ReLU : direct VPU conv --------
    # y1[oc, i, j] = relu(b1[oc] + sum_{di,dj} x[i+di, j+dj] * w1[oc, 0, di, dj])
    for oc in range(3):
        acc = None
        for di in range(K):
            for dj in range(K):
                w = w1_ref[oc * 9 + di * 3 + dj]            # SMEM scalar
                term = x_ref[di:di + H1, dj:dj + H1] * w    # shifted (26, 26) window
                acc = term if acc is None else acc + term
        y1_ref[oc, :, :] = jnp.maximum(acc + b1_ref[oc], 0.0)

    # ---- conv2 (3 -> 1 channel, 3x3 valid) + ReLU : direct VPU conv ---------
    # y2[i, j] = relu(b2 + sum_{c,di,dj} y1[c, i+di, j+dj] * w2[0, c, di, dj])
    acc2 = None
    for c in range(3):
        for di in range(K):
            for dj in range(K):
                w = w2_ref[c * 9 + di * 3 + dj]             # SMEM scalar
                term = y1_ref[c, di:di + H2, dj:dj + H2] * w   # (24, 24)
                acc2 = term if acc2 is None else acc2 + term
    y2 = jnp.maximum(acc2 + b2_ref[0], 0.0)                 # (24, 24)

    # ---- Flatten + Linear(576, 10) without an in-kernel reshape -------------
    # out[o] = sum_{i,j} y2[i, j] * W[o, i*24 + j] + b[o]
    #   a_ref[j, i*10 + o]     = W[o, i*24 + j]
    #   mask_ref[r, i*10 + o]  = (r == i)          (block-diagonal selector)
    #   gsel_ref[i*10 + o, o2] = (o == o2)         (per-class group sum)
    r = jnp.dot(y2, a_ref[...], preferred_element_type=jnp.float32)        # (24, 240)
    r = r * mask_ref[...]
    out24 = jnp.dot(r, gsel_ref[...], preferred_element_type=jnp.float32)  # (24, 10)
    o_ref[...] = jnp.sum(out24, axis=0, keepdims=True) + bf_ref[...]       # (1, 10)


# ---------------------------------------------------------------------------
# Wrapper: host-side weight re-arrangement (tiny, done once per call) + pallas_call
# ---------------------------------------------------------------------------
@jax.jit
def conv_model_forward(x, params):
    w1, b1, w2, b2, wf, bf = params
    n = x.shape[0]
    x2 = x.reshape(n, H_IN, H_IN).astype(jnp.float32)

    # Conv weights/biases as flat SMEM scalar tables (torch layout (out_c, in_c, kh, kw)).
    w1s = w1.astype(jnp.float32).reshape(27)   # idx = oc*9 + kh*3 + kw
    b1s = b1.astype(jnp.float32)
    w2s = w2.astype(jnp.float32).reshape(27)   # idx = c*9 + kh*3 + kw
    b2s = b2.astype(jnp.float32)

    # FC weight pre-arranged so the (24,24) -> (576,) flatten never happens in-kernel.
    wft = wf.astype(jnp.float32).T                                         # (576, 10)
    a = wft.reshape(H2, H2, N_CLASSES).transpose(1, 0, 2).reshape(H2, H2 * N_CLASSES)
    mask = jnp.repeat(jnp.eye(H2, dtype=jnp.float32), N_CLASSES, axis=1)   # (24, 240)
    gsel = jnp.tile(jnp.eye(N_CLASSES, dtype=jnp.float32), (H2, 1))        # (240, 10)
    bf2 = bf.astype(jnp.float32).reshape(1, N_CLASSES)

    smem = pl.BlockSpec(memory_space=pltpu.MemorySpace.SMEM)
    out = pl.pallas_call(
        _fused_forward_kernel,
        out_shape=jax.ShapeDtypeStruct((n, 1, N_CLASSES), jnp.float32),
        grid=(n,),
        in_specs=[
            pl.BlockSpec((None, H_IN, H_IN), lambda b: (b, 0, 0)),        # x: one image / step
            smem, smem, smem, smem,                                       # conv w/b scalars
            pl.BlockSpec((H2, H2 * N_CLASSES), lambda b: (0, 0)),         # a      (VMEM, resident)
            pl.BlockSpec((H2, H2 * N_CLASSES), lambda b: (0, 0)),         # mask   (VMEM, resident)
            pl.BlockSpec((H2 * N_CLASSES, N_CLASSES), lambda b: (0, 0)),  # gsel   (VMEM, resident)
            pl.BlockSpec((1, N_CLASSES), lambda b: (0, 0)),               # fc bias
        ],
        out_specs=pl.BlockSpec((None, 1, N_CLASSES), lambda b: (b, 0, 0)),
        scratch_shapes=[pltpu.VMEM((3, H1, H1), jnp.float32)],            # conv1 activations
        compiler_params=pltpu.CompilerParams(
            dimension_semantics=("parallel",)),                           # v7x: 2 TCs split batch
    )(x2, w1s, b1s, w2s, b2s, a, mask, gsel, bf2)
    return out.reshape(n, N_CLASSES)


# ---------------------------------------------------------------------------
# Pure-JAX reference (torch semantics) for a correctness check.
# ---------------------------------------------------------------------------
def reference_forward(x, params):
    w1, b1, w2, b2, wf, bf = params
    dn = ("NCHW", "OIHW", "NCHW")
    hp = jax.lax.Precision.HIGHEST
    y = jax.lax.conv_general_dilated(x, w1, (1, 1), "VALID",
                                     dimension_numbers=dn, precision=hp)
    y = jnp.maximum(y + b1.reshape(1, 3, 1, 1), 0.0)
    y = jax.lax.conv_general_dilated(y, w2, (1, 1), "VALID",
                                     dimension_numbers=dn, precision=hp)
    y = jnp.maximum(y + b2.reshape(1, 1, 1, 1), 0.0)
    flat = y.reshape(x.shape[0], -1)
    return jnp.dot(flat, wf.T, precision=hp) + bf


def init_params(key):
    k1, k2, k3, k4, k5, k6 = jax.random.split(key, 6)
    w1 = jax.random.normal(k1, (3, 1, 3, 3), jnp.float32) * 0.1   # Conv(1, 3, 3)
    b1 = jax.random.normal(k2, (3,), jnp.float32) * 0.1
    w2 = jax.random.normal(k3, (1, 3, 3, 3), jnp.float32) * 0.1   # Conv(3, 1, 3)
    b2 = jax.random.normal(k4, (1,), jnp.float32) * 0.1
    wf = jax.random.normal(k5, (10, FLAT), jnp.float32) * 0.05    # Linear(576, 10)
    bf = jax.random.normal(k6, (10,), jnp.float32) * 0.05
    return (w1, b1, w2, b2, wf, bf)


if __name__ == "__main__":
    root = jax.random.PRNGKey(0)
    pkey, xkey = jax.random.split(root)
    params = init_params(pkey)
    # Input (N, 1, 28, 28): two valid 3x3 convs -> (N, 1, 24, 24) -> flatten 576 -> Linear(576,10)
    x = jax.random.normal(xkey, (2, 1, 28, 28), jnp.float32)

    y = conv_model_forward(x, params)
    jax.block_until_ready(y)
    assert y.shape == (2, 10), y.shape

    y_ref = reference_forward(x, params)
    err = float(jnp.max(jnp.abs(y - y_ref)))
    assert err < 5e-3, f"mismatch vs reference: max abs err = {err}"
    print("KERNEL_OK")
</pallas_src>

<mosaic_0001>
module attributes {stable_mosaic.version = 11 : i64} {
  func.func @_fused_forward_kernel(%arg0: i32, %arg1: memref<1x28x28xf32, #tpu.memory_space<vmem>>, %arg2: memref<27xf32, #tpu.memory_space<smem>>, %arg3: memref<3xf32, #tpu.memory_space<smem>>, %arg4: memref<27xf32, #tpu.memory_space<smem>>, %arg5: memref<1xf32, #tpu.memory_space<smem>>, %arg6: memref<24x240xf32, #tpu.memory_space<vmem>>, %arg7: memref<24x240xf32, #tpu.memory_space<vmem>>, %arg8: memref<240x10xf32, #tpu.memory_space<vmem>>, %arg9: memref<1x10xf32, #tpu.memory_space<vmem>>, %arg10: memref<1x1x10xf32, #tpu.memory_space<vmem>>, %arg11: memref<3x26x26xf32, #tpu.memory_space<vmem>>) attributes {dimension_semantics = [#tpu.dimension_semantics<parallel>], iteration_bounds = array<i64: 2>, scalar_prefetch = 0 : i64, scratch_operands = 1 : i64, tpu.core_type = #tpu.core_type<tc>, window_params = [{transform_indices = @transform_0, window_bounds = array<i64: 1, 28, 28>}, {transform_indices = @transform_1, window_bounds = array<i64: 27>}, {transform_indices = @transform_2, window_bounds = array<i64: 3>}, {transform_indices = @transform_3, window_bounds = array<i64: 27>}, {transform_indices = @transform_4, window_bounds = array<i64: 1>}, {pipeline_mode = #tpu.pipeline_mode<synchronous>, transform_indices = @transform_5, window_bounds = array<i64: 24, 240>}, {pipeline_mode = #tpu.pipeline_mode<synchronous>, transform_indices = @transform_6, window_bounds = array<i64: 24, 240>}, {pipeline_mode = #tpu.pipeline_mode<synchronous>, transform_indices = @transform_7, window_bounds = array<i64: 240, 10>}, {pipeline_mode = #tpu.pipeline_mode<synchronous>, transform_indices = @transform_8, window_bounds = array<i64: 1, 10>}, {transform_indices = @transform_9, window_bounds = array<i64: 1, 1, 10>}]} {
    %c0 = arith.constant 0 : index
    %0 = memref.load %arg2[%c0] : memref<27xf32, #tpu.memory_space<smem>>
    %c0_0 = arith.constant 0 : index
    %c0_1 = arith.constant 0 : index
    %c0_2 = arith.constant 0 : index
    %1 = vector.load %arg1[%c0_0, %c0_1, %c0_2] : memref<1x28x28xf32, #tpu.memory_space<vmem>>, vector<1x26x26xf32>
    %2 = vector.shape_cast %1 : vector<1x26x26xf32> to vector<26x26xf32>
    %3 = vector.broadcast %0 : f32 to vector<26x26xf32>
    %4 = arith.mulf %2, %3 : vector<26x26xf32>
    %c1 = arith.constant 1 : index
    %5 = memref.load %arg2[%c1] : memref<27xf32, #tpu.memory_space<smem>>
    %c0_3 = arith.constant 0 : index
    %c0_4 = arith.constant 0 : index
    %c1_5 = arith.constant 1 : index
    %6 = vector.load %arg1[%c0_3, %c0_4, %c1_5] : memref<1x28x28xf32, #tpu.memory_space<vmem>>, vector<1x26x26xf32>
    %7 = vector.shape_cast %6 : vector<1x26x26xf32> to vector<26x26xf32>
    %8 = vector.broadcast %5 : f32 to vector<26x26xf32>
    %9 = arith.mulf %7, %8 : vector<26x26xf32>
    %10 = arith.addf %4, %9 : vector<26x26xf32>
    %c2 = arith.constant 2 : index
    %11 = memref.load %arg2[%c2] : memref<27xf32, #tpu.memory_space<smem>>
    %c0_6 = arith.constant 0 : index
    %c0_7 = arith.constant 0 : index
    %c2_8 = arith.constant 2 : index
    %12 = vector.load %arg1[%c0_6, %c0_7, %c2_8] : memref<1x28x28xf32, #tpu.memory_space<vmem>>, vector<1x26x26xf32>
    %13 = vector.shape_cast %12 : vector<1x26x26xf32> to vector<26x26xf32>
    %14 = vector.broadcast %11 : f32 to vector<26x26xf32>
    %15 = arith.mulf %13, %14 : vector<26x26xf32>
    %16 = arith.addf %10, %15 : vector<26x26xf32>
    %c3 = arith.constant 3 : index
    %17 = memref.load %arg2[%c3] : memref<27xf32, #tpu.memory_space<smem>>
    %c0_9 = arith.constant 0 : index
    %c1_10 = arith.constant 1 : index
    %c0_11 = arith.constant 0 : index
    %18 = vector.load %arg1[%c0_9, %c1_10, %c0_11] : memref<1x28x28xf32, #tpu.memory_space<vmem>>, vector<1x26x26xf32>
    %19 = vector.shape_cast %18 : vector<1x26x26xf32> to vector<26x26xf32>
    %20 = vector.broadcast %17 : f32 to vector<26x26xf32>
    %21 = arith.mulf %19, %20 : vector<26x26xf32>
    %22 = arith.addf %16, %21 : vector<26x26xf32>
    %c4 = arith.constant 4 : index
    %23 = memref.load %arg2[%c4] : memref<27xf32, #tpu.memory_space<smem>>
    %c0_12 = arith.constant 0 : index
    %c1_13 = arith.constant 1 : index
    %c1_14 = arith.constant 1 : index
    %24 = vector.load %arg1[%c0_12, %c1_13, %c1_14] : memref<1x28x28xf32, #tpu.memory_space<vmem>>, vector<1x26x26xf32>
    %25 = vector.shape_cast %24 : vector<1x26x26xf32> to vector<26x26xf32>
    %26 = vector.broadcast %23 : f32 to vector<26x26xf32>
    %27 = arith.mulf %25, %26 : vector<26x26xf32>
    %28 = arith.addf %22, %27 : vector<26x26xf32>
    %c5 = arith.constant 5 : index
    %29 = memref.load %arg2[%c5] : memref<27xf32, #tpu.memory_space<smem>>
    %c0_15 = arith.constant 0 : index
    %c1_16 = arith.constant 1 : index
    %c2_17 = arith.constant 2 : index
    %30 = vector.load %arg1[%c0_15, %c1_16, %c2_17] : memref<1x28x28xf32, #tpu.memory_space<vmem>>, vector<1x26x26xf32>
    %31 = vector.shape_cast %30 : vector<1x26x26xf32> to vector<26x26xf32>
    %32 = vector.broadcast %29 : f32 to vector<26x26xf32>
    %33 = arith.mulf %31, %32 : vector<26x26xf32>
    %34 = arith.addf %28, %33 : vector<26x26xf32>
    %c6 = arith.constant 6 : index
    %35 = memref.load %arg2[%c6] : memref<27xf32, #tpu.memory_space<smem>>
    %c0_18 = arith.constant 0 : index
    %c2_19 = arith.constant 2 : index
    %c0_20 = arith.constant 0 : index
    %36 = vector.load %arg1[%c0_18, %c2_19, %c0_20] : memref<1x28x28xf32, #tpu.memory_space<vmem>>, vector<1x26x26xf32>
    %37 = vector.shape_cast %36 : vector<1x26x26xf32> to vector<26x26xf32>
    %38 = vector.broadcast %35 : f32 to vector<26x26xf32>
    %39 = arith.mulf %37, %38 : vector<26x26xf32>
    %40 = arith.addf %34, %39 : vector<26x26xf32>
    %c7 = arith.constant 7 : index
    %41 = memref.load %arg2[%c7] : memref<27xf32, #tpu.memory_space<smem>>
    %c0_21 = arith.constant 0 : index
    %c2_22 = arith.constant 2 : index
    %c1_23 = arith.constant 1 : index
    %42 = vector.load %arg1[%c0_21, %c2_22, %c1_23] : memref<1x28x28xf32, #tpu.memory_space<vmem>>, vector<1x26x26xf32>
    %43 = vector.shape_cast %42 : vector<1x26x26xf32> to vector<26x26xf32>
    %44 = vector.broadcast %41 : f32 to vector<26x26xf32>
    %45 = arith.mulf %43, %44 : vector<26x26xf32>
    %46 = arith.addf %40, %45 : vector<26x26xf32>
    %c8 = arith.constant 8 : index
    %47 = memref.load %arg2[%c8] : memref<27xf32, #tpu.memory_space<smem>>
    %c0_24 = arith.constant 0 : index
    %c2_25 = arith.constant 2 : index
    %c2_26 = arith.constant 2 : index
    %48 = vector.load %arg1[%c0_24, %c2_25, %c2_26] : memref<1x28x28xf32, #tpu.memory_space<vmem>>, vector<1x26x26xf32>
    %49 = vector.shape_cast %48 : vector<1x26x26xf32> to vector<26x26xf32>
    %50 = vector.broadcast %47 : f32 to vector<26x26xf32>
    %51 = arith.mulf %49, %50 : vector<26x26xf32>
    %52 = arith.addf %46, %51 : vector<26x26xf32>
    %c0_27 = arith.constant 0 : index
    %53 = memref.load %arg3[%c0_27] : memref<3xf32, #tpu.memory_space<smem>>
    %54 = vector.broadcast %53 : f32 to vector<26x26xf32>
    %55 = arith.addf %52, %54 : vector<26x26xf32>
    %cst = arith.constant 0.000000e+00 : f32
    %56 = vector.broadcast %cst : f32 to vector<26x26xf32>
    %57 = arith.maximumf %55, %56 : vector<26x26xf32>
    %c0_28 = arith.constant 0 : index
    %c0_29 = arith.constant 0 : index
    %c0_30 = arith.constant 0 : index
    %58 = vector.load %arg11[%c0_28, %c0_29, %c0_30] : memref<3x26x26xf32, #tpu.memory_space<vmem>>, vector<1x26x26xf32>
    %59 = vector.shape_cast %58 : vector<1x26x26xf32> to vector<26x26xf32>
    %60 = vector.shape_cast %57 : vector<26x26xf32> to vector<1x26x26xf32>
    tpu.vector_store %arg11[%c0_28, %c0_29, %c0_30], %60 {strides = array<i32>} : memref<3x26x26xf32, #tpu.memory_space<vmem>>, vector<1x26x26xf32>,
    %c9 = arith.constant 9 : index
    %61 = memref.load %arg2[%c9] : memref<27xf32, #tpu.memory_space<smem>>
    %c0_31 = arith.constant 0 : index
    %c0_32 = arith.constant 0 : index
    %c0_33 = arith.constant 0 : index
    %62 = vector.load %arg1[%c0_31, %c0_32, %c0_33] : memref<1x28x28xf32, #tpu.memory_space<vmem>>, vector<1x26x26xf32>
    %63 = vector.shape_cast %62 : vector<1x26x26xf32> to vector<26x26xf32>
    %64 = vector.broadcast %61 : f32 to vector<26x26xf32>
    %65 = arith.mulf %63, %64 : vector<26x26xf32>
    %c10 = arith.constant 10 : index
    %66 = memref.load %arg2[%c10] : memref<27xf32, #tpu.memory_space<smem>>
    %c0_34 = arith.constant 0 : index
    %c0_35 = arith.constant 0 : index
    %c1_36 = arith.constant 1 : index
    %67 = vector.load %arg1[%c0_34, %c0_35, %c1_36] : memref<1x28x28xf32, #tpu.memory_space<vmem>>, vector<1x26x26xf32>
    %68 = vector.shape_cast %67 : vector<1x26x26xf32> to vector<26x26xf32>
    %69 = vector.broadcast %66 : f32 to vector<26x26xf32>
    %70 = arith.mulf %68, %69 : vector<26x26xf32>
    %71 = arith.addf %65, %70 : vector<26x26xf32>
    %c11 = arith.constant 11 : index
    %72 = memref.load %arg2[%c11] : memref<27xf32, #tpu.memory_space<smem>>
    %c0_37 = arith.constant 0 : index
    %c0_38 = arith.constant 0 : index
    %c2_39 = arith.constant 2 : index
    %73 = vector.load %arg1[%c0_37, %c0_38, %c2_39] : memref<1x28x28xf32, #tpu.memory_space<vmem>>, vector<1x26x26xf32>
    %74 = vector.shape_cast %73 : vector<1x26x26xf32> to vector<26x26xf32>
    %75 = vector.broadcast %72 : f32 to vector<26x26xf32>
    %76 = arith.mulf %74, %75 : vector<26x26xf32>
    %77 = arith.addf %71, %76 : vector<26x26xf32>
    %c12 = arith.constant 12 : index
    %78 = memref.load %arg2[%c12] : memref<27xf32, #tpu.memory_space<smem>>
    %c0_40 = arith.constant 0 : index
    %c1_41 = arith.constant 1 : index
    %c0_42 = arith.constant 0 : index
    %79 = vector.load %arg1[%c0_40, %c1_41, %c0_42] : memref<1x28x28xf32, #tpu.memory_space<vmem>>, vector<1x26x26xf32>
    %80 = vector.shape_cast %79 : vector<1x26x26xf32> to vector<26x26xf32>
    %81 = vector.broadcast %78 : f32 to vector<26x26xf32>
    %82 = arith.mulf %80, %81 : vector<26x26xf32>
    %83 = arith.addf %77, %82 : vector<26x26xf32>
    %c13 = arith.constant 13 : index
    %84 = memref.load %arg2[%c13] : memref<27xf32, #tpu.memory_space<smem>>
    %c0_43 = arith.constant 0 : index
    %c1_44 = arith.constant 1 : index
    %c1_45 = arith.constant 1 : index
    %85 = vector.load %arg1[%c0_43, %c1_44, %c1_45] : memref<1x28x28xf32, #tpu.memory_space<vmem>>, vector<1x26x26xf32>
    %86 = vector.shape_cast %85 : vector<1x26x26xf32> to vector<26x26xf32>
    %87 = vector.broadcast %84 : f32 to vector<26x26xf32>
    %88 = arith.mulf %86, %87 : vector<26x26xf32>
    %89 = arith.addf %83, %88 : vector<26x26xf32>
    %c14 = arith.constant 14 : index
    %90 = memref.load %arg2[%c14] : memref<27xf32, #tpu.memory_space<smem>>
    %c0_46 = arith.constant 0 : index
    %c1_47 = arith.constant 1 : index
    %c2_48 = arith.constant 2 : index
    %91 = vector.load %arg1[%c0_46, %c1_47, %c2_48] : memref<1x28x28xf32, #tpu.memory_space<vmem>>, vector<1x26x26xf32>
    %92 = vector.shape_cast %91 : vector<1x26x26xf32> to vector<26x26xf32>
    %93 = vector.broadcast %90 : f32 to vector<26x26xf32>
    %94 = arith.mulf %92, %93 : vector<26x26xf32>
    %95 = arith.addf %89, %94 : vector<26x26xf32>
    %c15 = arith.constant 15 : index
    %96 = memref.load %arg2[%c15] : memref<27xf32, #tpu.memory_space<smem>>
    %c0_49 = arith.constant 0 : index
    %c2_50 = arith.constant 2 : index
    %c0_51 = arith.constant 0 : index
    %97 = vector.load %arg1[%c0_49, %c2_50, %c0_51] : memref<1x28x28xf32, #tpu.memory_space<vmem>>, vector<1x26x26xf32>
    %98 = vector.shape_cast %97 : vector<1x26x26xf32> to vector<26x26xf32>
    %99 = vector.broadcast %96 : f32 to vector<26x26xf32>
    %100 = arith.mulf %98, %99 : vector<26x26xf32>
    %101 = arith.addf %95, %100 : vector<26x26xf32>
    %c16 = arith.constant 16 : index
    %102 = memref.load %arg2[%c16] : memref<27xf32, #tpu.memory_space<smem>>
    %c0_52 = arith.constant 0 : index
    %c2_53 = arith.constant 2 : index
    %c1_54 = arith.constant 1 : index
    %103 = vector.load %arg1[%c0_52, %c2_53, %c1_54] : memref<1x28x28xf32, #tpu.memory_space<vmem>>, vector<1x26x26xf32>
    %104 = vector.shape_cast %103 : vector<1x26x26xf32> to vector<26x26xf32>
    %105 = vector.broadcast %102 : f32 to vector<26x26xf32>
    %106 = arith.mulf %104, %105 : vector<26x26xf32>
    %107 = arith.addf %101, %106 : vector<26x26xf32>
    %c17 = arith.constant 17 : index
    %108 = memref.load %arg2[%c17] : memref<27xf32, #tpu.memory_space<smem>>
    %c0_55 = arith.constant 0 : index
    %c2_56 = arith.constant 2 : index
    %c2_57 = arith.constant 2 : index
    %109 = vector.load %arg1[%c0_55, %c2_56, %c2_57] : memref<1x28x28xf32, #tpu.memory_space<vmem>>, vector<1x26x26xf32>
    %110 = vector.shape_cast %109 : vector<1x26x26xf32> to vector<26x26xf32>
    %111 = vector.broadcast %108 : f32 to vector<26x26xf32>
    %112 = arith.mulf %110, %111 : vector<26x26xf32>
    %113 = arith.addf %107, %112 : vector<26x26xf32>
    %c1_58 = arith.constant 1 : index
    %114 = memref.load %arg3[%c1_58] : memref<3xf32, #tpu.memory_space<smem>>
    %115 = vector.broadcast %114 : f32 to vector<26x26xf32>
    %116 = arith.addf %113, %115 : vector<26x26xf32>
    %cst_59 = arith.constant 0.000000e+00 : f32
    %117 = vector.broadcast %cst_59 : f32 to vector<26x26xf32>
    %118 = arith.maximumf %116, %117 : vector<26x26xf32>
    %c1_60 = arith.constant 1 : index
    %c0_61 = arith.constant 0 : index
    %c0_62 = arith.constant 0 : index
    %119 = vector.load %arg11[%c1_60, %c0_61, %c0_62] : memref<3x26x26xf32, #tpu.memory_space<vmem>>, vector<1x26x26xf32>
    %120 = vector.shape_cast %119 : vector<1x26x26xf32> to vector<26x26xf32>
    %121 = vector.shape_cast %118 : vector<26x26xf32> to vector<1x26x26xf32>
    tpu.vector_store %arg11[%c1_60, %c0_61, %c0_62], %121 {strides = array<i32>} : memref<3x26x26xf32, #tpu.memory_space<vmem>>, vector<1x26x26xf32>,
    %c18 = arith.constant 18 : index
    %122 = memref.load %arg2[%c18] : memref<27xf32, #tpu.memory_space<smem>>
    %c0_63 = arith.constant 0 : index
    %c0_64 = arith.constant 0 : index
    %c0_65 = arith.constant 0 : index
    %123 = vector.load %arg1[%c0_63, %c0_64, %c0_65] : memref<1x28x28xf32, #tpu.memory_space<vmem>>, vector<1x26x26xf32>
    %124 = vector.shape_cast %123 : vector<1x26x26xf32> to vector<26x26xf32>
    %125 = vector.broadcast %122 : f32 to vector<26x26xf32>
    %126 = arith.mulf %124, %125 : vector<26x26xf32>
    %c19 = arith.constant 19 : index
    %127 = memref.load %arg2[%c19] : memref<27xf32, #tpu.memory_space<smem>>
    %c0_66 = arith.constant 0 : index
    %c0_67 = arith.constant 0 : index
    %c1_68 = arith.constant 1 : index
    %128 = vector.load %arg1[%c0_66, %c0_67, %c1_68] : memref<1x28x28xf32, #tpu.memory_space<vmem>>, vector<1x26x26xf32>
    %129 = vector.shape_cast %128 : vector<1x26x26xf32> to vector<26x26xf32>
    %130 = vector.broadcast %127 : f32 to vector<26x26xf32>
    %131 = arith.mulf %129, %130 : vector<26x26xf32>
    %132 = arith.addf %126, %131 : vector<26x26xf32>
    %c20 = arith.constant 20 : index
    %133 = memref.load %arg2[%c20] : memref<27xf32, #tpu.memory_space<smem>>
    %c0_69 = arith.constant 0 : index
    %c0_70 = arith.constant 0 : index
    %c2_71 = arith.constant 2 : index
    %134 = vector.load %arg1[%c0_69, %c0_70, %c2_71] : memref<1x28x28xf32, #tpu.memory_space<vmem>>, vector<1x26x26xf32>
    %135 = vector.shape_cast %134 : vector<1x26x26xf32> to vector<26x26xf32>
    %136 = vector.broadcast %133 : f32 to vector<26x26xf32>
    %137 = arith.mulf %135, %136 : vector<26x26xf32>
    %138 = arith.addf %132, %137 : vector<26x26xf32>
    %c21 = arith.constant 21 : index
    %139 = memref.load %arg2[%c21] : memref<27xf32, #tpu.memory_space<smem>>
    %c0_72 = arith.constant 0 : index
    %c1_73 = arith.constant 1 : index
    %c0_74 = arith.constant 0 : index
    %140 = vector.load %arg1[%c0_72, %c1_73, %c0_74] : memref<1x28x28xf32, #tpu.memory_space<vmem>>, vector<1x26x26xf32>
    %141 = vector.shape_cast %140 : vector<1x26x26xf32> to vector<26x26xf32>
    %142 = vector.broadcast %139 : f32 to vector<26x26xf32>
    %143 = arith.mulf %141, %142 : vector<26x26xf32>
    %144 = arith.addf %138, %143 : vector<26x26xf32>
    %c22 = arith.constant 22 : index
    %145 = memref.load %arg2[%c22] : memref<27xf32, #tpu.memory_space<smem>>
    %c0_75 = arith.constant 0 : index
    %c1_76 = arith.constant 1 : index
    %c1_77 = arith.constant 1 : index
    %146 = vector.load %arg1[%c0_75, %c1_76, %c1_77] : memref<1x28x28xf32, #tpu.memory_space<vmem>>, vector<1x26x26xf32>
    %147 = vector.shape_cast %146 : vector<1x26x26xf32> to vector<26x26xf32>
    %148 = vector.broadcast %145 : f32 to vector<26x26xf32>
    %149 = arith.mulf %147, %148 : vector<26x26xf32>
    %150 = arith.addf %144, %149 : vector<26x26xf32>
    %c23 = arith.constant 23 : index
    %151 = memref.load %arg2[%c23] : memref<27xf32, #tpu.memory_space<smem>>
    %c0_78 = arith.constant 0 : index
    %c1_79 = arith.constant 1 : index
    %c2_80 = arith.constant 2 : index
    %152 = vector.load %arg1[%c0_78, %c1_79, %c2_80] : memref<1x28x28xf32, #tpu.memory_space<vmem>>, vector<1x26x26xf32>
    %153 = vector.shape_cast %152 : vector<1x26x26xf32> to vector<26x26xf32>
    %154 = vector.broadcast %151 : f32 to vector<26x26xf32>
    %155 = arith.mulf %153, %154 : vector<26x26xf32>
    %156 = arith.addf %150, %155 : vector<26x26xf32>
    %c24 = arith.constant 24 : index
    %157 = memref.load %arg2[%c24] : memref<27xf32, #tpu.memory_space<smem>>
    %c0_81 = arith.constant 0 : index
    %c2_82 = arith.constant 2 : index
    %c0_83 = arith.constant 0 : index
    %158 = vector.load %arg1[%c0_81, %c2_82, %c0_83] : memref<1x28x28xf32, #tpu.memory_space<vmem>>, vector<1x26x26xf32>
    %159 = vector.shape_cast %158 : vector<1x26x26xf32> to vector<26x26xf32>
    %160 = vector.broadcast %157 : f32 to vector<26x26xf32>
    %161 = arith.mulf %159, %160 : vector<26x26xf32>
    %162 = arith.addf %156, %161 : vector<26x26xf32>
    %c25 = arith.constant 25 : index
    %163 = memref.load %arg2[%c25] : memref<27xf32, #tpu.memory_space<smem>>
    %c0_84 = arith.constant 0 : index
    %c2_85 = arith.constant 2 : index
    %c1_86 = arith.constant 1 : index
    %164 = vector.load %arg1[%c0_84, %c2_85, %c1_86] : memref<1x28x28xf32, #tpu.memory_space<vmem>>, vector<1x26x26xf32>
    %165 = vector.shape_cast %164 : vector<1x26x26xf32> to vector<26x26xf32>
    %166 = vector.broadcast %163 : f32 to vector<26x26xf32>
    %167 = arith.mulf %165, %166 : vector<26x26xf32>
    %168 = arith.addf %162, %167 : vector<26x26xf32>
    %c26 = arith.constant 26 : index
    %169 = memref.load %arg2[%c26] : memref<27xf32, #tpu.memory_space<smem>>
    %c0_87 = arith.constant 0 : index
    %c2_88 = arith.constant 2 : index
    %c2_89 = arith.constant 2 : index
    %170 = vector.load %arg1[%c0_87, %c2_88, %c2_89] : memref<1x28x28xf32, #tpu.memory_space<vmem>>, vector<1x26x26xf32>
    %171 = vector.shape_cast %170 : vector<1x26x26xf32> to vector<26x26xf32>
    %172 = vector.broadcast %169 : f32 to vector<26x26xf32>
    %173 = arith.mulf %171, %172 : vector<26x26xf32>
    %174 = arith.addf %168, %173 : vector<26x26xf32>
    %c2_90 = arith.constant 2 : index
    %175 = memref.load %arg3[%c2_90] : memref<3xf32, #tpu.memory_space<smem>>
    %176 = vector.broadcast %175 : f32 to vector<26x26xf32>
    %177 = arith.addf %174, %176 : vector<26x26xf32>
    %cst_91 = arith.constant 0.000000e+00 : f32
    %178 = vector.broadcast %cst_91 : f32 to vector<26x26xf32>
    %179 = arith.maximumf %177, %178 : vector<26x26xf32>
    %c2_92 = arith.constant 2 : index
    %c0_93 = arith.constant 0 : index
    %c0_94 = arith.constant 0 : index
    %180 = vector.load %arg11[%c2_92, %c0_93, %c0_94] : memref<3x26x26xf32, #tpu.memory_space<vmem>>, vector<1x26x26xf32>
    %181 = vector.shape_cast %180 : vector<1x26x26xf32> to vector<26x26xf32>
    %182 = vector.shape_cast %179 : vector<26x26xf32> to vector<1x26x26xf32>
    tpu.vector_store %arg11[%c2_92, %c0_93, %c0_94], %182 {strides = array<i32>} : memref<3x26x26xf32, #tpu.memory_space<vmem>>, vector<1x26x26xf32>,
    %c0_95 = arith.constant 0 : index
    %183 = memref.load %arg4[%c0_95] : memref<27xf32, #tpu.memory_space<smem>>
    %c0_96 = arith.constant 0 : index
    %c0_97 = arith.constant 0 : index
    %c0_98 = arith.constant 0 : index
    %184 = vector.load %arg11[%c0_96, %c0_97, %c0_98] : memref<3x26x26xf32, #tpu.memory_space<vmem>>, vector<1x24x24xf32>
    %185 = vector.shape_cast %184 : vector<1x24x24xf32> to vector<24x24xf32>
    %186 = vector.broadcast %183 : f32 to vector<24x24xf32>
    %187 = arith.mulf %185, %186 : vector<24x24xf32>
    %c1_99 = arith.constant 1 : index
    %188 = memref.load %arg4[%c1_99] : memref<27xf32, #tpu.memory_space<smem>>
    %c0_100 = arith.constant 0 : index
    %c0_101 = arith.constant 0 : index
    %c1_102 = arith.constant 1 : index
    %189 = vector.load %arg11[%c0_100, %c0_101, %c1_102] : memref<3x26x26xf32, #tpu.memory_space<vmem>>, vector<1x24x24xf32>
    %190 = vector.shape_cast %189 : vector<1x24x24xf32> to vector<24x24xf32>
    %191 = vector.broadcast %188 : f32 to vector<24x24xf32>
    %192 = arith.mulf %190, %191 : vector<24x24xf32>
    %193 = arith.addf %187, %192 : vector<24x24xf32>
    %c2_103 = arith.constant 2 : index
    %194 = memref.load %arg4[%c2_103] : memref<27xf32, #tpu.memory_space<smem>>
    %c0_104 = arith.constant 0 : index
    %c0_105 = arith.constant 0 : index
    %c2_106 = arith.constant 2 : index
    %195 = vector.load %arg11[%c0_104, %c0_105, %c2_106] : memref<3x26x26xf32, #tpu.memory_space<vmem>>, vector<1x24x24xf32>
    %196 = vector.shape_cast %195 : vector<1x24x24xf32> to vector<24x24xf32>
    %197 = vector.broadcast %194 : f32 to vector<24x24xf32>
    %198 = arith.mulf %196, %197 : vector<24x24xf32>
    %199 = arith.addf %193, %198 : vector<24x24xf32>
    %c3_107 = arith.constant 3 : index
    %200 = memref.load %arg4[%c3_107] : memref<27xf32, #tpu.memory_space<smem>>
    %c0_108 = arith.constant 0 : index
    %c1_109 = arith.constant 1 : index
    %c0_110 = arith.constant 0 : index
    %201 = vector.load %arg11[%c0_108, %c1_109, %c0_110] : memref<3x26x26xf32, #tpu.memory_space<vmem>>, vector<1x24x24xf32>
    %202 = vector.shape_cast %201 : vector<1x24x24xf32> to vector<24x24xf32>
    %203 = vector.broadcast %200 : f32 to vector<24x24xf32>
    %204 = arith.mulf %202, %203 : vector<24x24xf32>
    %205 = arith.addf %199, %204 : vector<24x24xf32>
    %c4_111 = arith.constant 4 : index
    %206 = memref.load %arg4[%c4_111] : memref<27xf32, #tpu.memory_space<smem>>
    %c0_112 = arith.constant 0 : index
    %c1_113 = arith.constant 1 : index
    %c1_114 = arith.constant 1 : index
    %207 = vector.load %arg11[%c0_112, %c1_113, %c1_114] : memref<3x26x26xf32, #tpu.memory_space<vmem>>, vector<1x24x24xf32>
    %208 = vector.shape_cast %207 : vector<1x24x24xf32> to vector<24x24xf32>
    %209 = vector.broadcast %206 : f32 to vector<24x24xf32>
    %210 = arith.mulf %208, %209 : vector<24x24xf32>
    %211 = arith.addf %205, %210 : vector<24x24xf32>
    %c5_115 = arith.constant 5 : index
    %212 = memref.load %arg4[%c5_115] : memref<27xf32, #tpu.memory_space<smem>>
    %c0_116 = arith.constant 0 : index
    %c1_117 = arith.constant 1 : index
    %c2_118 = arith.constant 2 : index
    %213 = vector.load %arg11[%c0_116, %c1_117, %c2_118] : memref<3x26x26xf32, #tpu.memory_space<vmem>>, vector<1x24x24xf32>
    %214 = vector.shape_cast %213 : vector<1x24x24xf32> to vector<24x24xf32>
    %215 = vector.broadcast %212 : f32 to vector<24x24xf32>
    %216 = arith.mulf %214, %215 : vector<24x24xf32>
    %217 = arith.addf %211, %216 : vector<24x24xf32>
    %c6_119 = arith.constant 6 : index
    %218 = memref.load %arg4[%c6_119] : memref<27xf32, #tpu.memory_space<smem>>
    %c0_120 = arith.constant 0 : index
    %c2_121 = arith.constant 2 : index
    %c0_122 = arith.constant 0 : index
    %219 = vector.load %arg11[%c0_120, %c2_121, %c0_122] : memref<3x26x26xf32, #tpu.memory_space<vmem>>, vector<1x24x24xf32>
    %220 = vector.shape_cast %219 : vector<1x24x24xf32> to vector<24x24xf32>
    %221 = vector.broadcast %218 : f32 to vector<24x24xf32>
    %222 = arith.mulf %220, %221 : vector<24x24xf32>
    %223 = arith.addf %217, %222 : vector<24x24xf32>
    %c7_123 = arith.constant 7 : index
    %224 = memref.load %arg4[%c7_123] : memref<27xf32, #tpu.memory_space<smem>>
    %c0_124 = arith.constant 0 : index
    %c2_125 = arith.constant 2 : index
    %c1_126 = arith.constant 1 : index
    %225 = vector.load %arg11[%c0_124, %c2_125, %c1_126] : memref<3x26x26xf32, #tpu.memory_space<vmem>>, vector<1x24x24xf32>
    %226 = vector.shape_cast %225 : vector<1x24x24xf32> to vector<24x24xf32>
    %227 = vector.broadcast %224 : f32 to vector<24x24xf32>
    %228 = arith.mulf %226, %227 : vector<24x24xf32>
    %229 = arith.addf %223, %228 : vector<24x24xf32>
    %c8_127 = arith.constant 8 : index
    %230 = memref.load %arg4[%c8_127] : memref<27xf32, #tpu.memory_space<smem>>
    %c0_128 = arith.constant 0 : index
    %c2_129 = arith.constant 2 : index
    %c2_130 = arith.constant 2 : index
    %231 = vector.load %arg11[%c0_128, %c2_129, %c2_130] : memref<3x26x26xf32, #tpu.memory_space<vmem>>, vector<1x24x24xf32>
    %232 = vector.shape_cast %231 : vector<1x24x24xf32> to vector<24x24xf32>
    %233 = vector.broadcast %230 : f32 to vector<24x24xf32>
    %234 = arith.mulf %232, %233 : vector<24x24xf32>
    %235 = arith.addf %229, %234 : vector<24x24xf32>
    %c9_131 = arith.constant 9 : index
    %236 = memref.load %arg4[%c9_131] : memref<27xf32, #tpu.memory_space<smem>>
    %c1_132 = arith.constant 1 : index
    %c0_133 = arith.constant 0 : index
    %c0_134 = arith.constant 0 : index
    %237 = vector.load %arg11[%c1_132, %c0_133, %c0_134] : memref<3x26x26xf32, #tpu.memory_space<vmem>>, vector<1x24x24xf32>
    %238 = vector.shape_cast %237 : vector<1x24x24xf32> to vector<24x24xf32>
    %239 = vector.broadcast %236 : f32 to vector<24x24xf32>
    %240 = arith.mulf %238, %239 : vector<24x24xf32>
    %241 = arith.addf %235, %240 : vector<24x24xf32>
    %c10_135 = arith.constant 10 : index
    %242 = memref.load %arg4[%c10_135] : memref<27xf32, #tpu.memory_space<smem>>
    %c1_136 = arith.constant 1 : index
    %c0_137 = arith.constant 0 : index
    %c1_138 = arith.constant 1 : index
    %243 = vector.load %arg11[%c1_136, %c0_137, %c1_138] : memref<3x26x26xf32, #tpu.memory_space<vmem>>, vector<1x24x24xf32>
    %244 = vector.shape_cast %243 : vector<1x24x24xf32> to vector<24x24xf32>
    %245 = vector.broadcast %242 : f32 to vector<24x24xf32>
    %246 = arith.mulf %244, %245 : vector<24x24xf32>
    %247 = arith.addf %241, %246 : vector<24x24xf32>
    %c11_139 = arith.constant 11 : index
    %248 = memref.load %arg4[%c11_139] : memref<27xf32, #tpu.memory_space<smem>>
    %c1_140 = arith.constant 1 : index
    %c0_141 = arith.constant 0 : index
    %c2_142 = arith.constant 2 : index
    %249 = vector.load %arg11[%c1_140, %c0_141, %c2_142] : memref<3x26x26xf32, #tpu.memory_space<vmem>>, vector<1x24x24xf32>
    %250 = vector.shape_cast %249 : vector<1x24x24xf32> to vector<24x24xf32>
    %251 = vector.broadcast %248 : f32 to vector<24x24xf32>
    %252 = arith.mulf %250, %251 : vector<24x24xf32>
    %253 = arith.addf %247, %252 : vector<24x24xf32>
    %c12_143 = arith.constant 12 : index
    %254 = memref.load %arg4[%c12_143] : memref<27xf32, #tpu.memory_space<smem>>
    %c1_144 = arith.constant 1 : index
    %c1_145 = arith.constant 1 : index
    %c0_146 = arith.constant 0 : index
    %255 = vector.load %arg11[%c1_144, %c1_145, %c0_146] : memref<3x26x26xf32, #tpu.memory_space<vmem>>, vector<1x24x24xf32>
    %256 = vector.shape_cast %255 : vector<1x24x24xf32> to vector<24x24xf32>
    %257 = vector.broadcast %254 : f32 to vector<24x24xf32>
    %258 = arith.mulf %256, %257 : vector<24x24xf32>
    %259 = arith.addf %253, %258 : vector<24x24xf32>
    %c13_147 = arith.constant 13 : index
    %260 = memref.load %arg4[%c13_147] : memref<27xf32, #tpu.memory_space<smem>>
    %c1_148 = arith.constant 1 : index
    %c1_149 = arith.constant 1 : index
    %c1_150 = arith.constant 1 : index
    %261 = vector.load %arg11[%c1_148, %c1_149, %c1_150] : memref<3x26x26xf32, #tpu.memory_space<vmem>>, vector<1x24x24xf32>
    %262 = vector.shape_cast %261 : vector<1x24x24xf32> to vector<24x24xf32>
    %263 = vector.broadcast %260 : f32 to vector<24x24xf32>
    %264 = arith.mulf %262, %263 : vector<24x24xf32>
    %265 = arith.addf %259, %264 : vector<24x24xf32>
    %c14_151 = arith.constant 14 : index
    %266 = memref.load %arg4[%c14_151] : memref<27xf32, #tpu.memory_space<smem>>
    %c1_152 = arith.constant 1 : index
    %c1_153 = arith.constant 1 : index
    %c2_154 = arith.constant 2 : index
    %267 = vector.load %arg11[%c1_152, %c1_153, %c2_154] : memref<3x26x26xf32, #tpu.memory_space<vmem>>, vector<1x24x24xf32>
    %268 = vector.shape_cast %267 : vector<1x24x24xf32> to vector<24x24xf32>
    %269 = vector.broadcast %266 : f32 to vector<24x24xf32>
    %270 = arith.mulf %268, %269 : vector<24x24xf32>
    %271 = arith.addf %265, %270 : vector<24x24xf32>
    %c15_155 = arith.constant 15 : index
    %272 = memref.load %arg4[%c15_155] : memref<27xf32, #tpu.memory_space<smem>>
    %c1_156 = arith.constant 1 : index
    %c2_157 = arith.constant 2 : index
    %c0_158 = arith.constant 0 : index
    %273 = vector.load %arg11[%c1_156, %c2_157, %c0_158] : memref<3x26x26xf32, #tpu.memory_space<vmem>>, vector<1x24x24xf32>
    %274 = vector.shape_cast %273 : vector<1x24x24xf32> to vector<24x24xf32>
    %275 = vector.broadcast %272 : f32 to vector<24x24xf32>
    %276 = arith.mulf %274, %275 : vector<24x24xf32>
    %277 = arith.addf %271, %276 : vector<24x24xf32>
    %c16_159 = arith.constant 16 : index
    %278 = memref.load %arg4[%c16_159] : memref<27xf32, #tpu.memory_space<smem>>
    %c1_160 = arith.constant 1 : index
    %c2_161 = arith.constant 2 : index
    %c1_162 = arith.constant 1 : index
    %279 = vector.load %arg11[%c1_160, %c2_161, %c1_162] : memref<3x26x26xf32, #tpu.memory_space<vmem>>, vector<1x24x24xf32>
    %280 = vector.shape_cast %279 : vector<1x24x24xf32> to vector<24x24xf32>
    %281 = vector.broadcast %278 : f32 to vector<24x24xf32>
    %282 = arith.mulf %280, %281 : vector<24x24xf32>
    %283 = arith.addf %277, %282 : vector<24x24xf32>
    %c17_163 = arith.constant 17 : index
    %284 = memref.load %arg4[%c17_163] : memref<27xf32, #tpu.memory_space<smem>>
    %c1_164 = arith.constant 1 : index
    %c2_165 = arith.constant 2 : index
    %c2_166 = arith.constant 2 : index
    %285 = vector.load %arg11[%c1_164, %c2_165, %c2_166] : memref<3x26x26xf32, #tpu.memory_space<vmem>>, vector<1x24x24xf32>
    %286 = vector.shape_cast %285 : vector<1x24x24xf32> to vector<24x24xf32>
    %287 = vector.broadcast %284 : f32 to vector<24x24xf32>
    %288 = arith.mulf %286, %287 : vector<24x24xf32>
    %289 = arith.addf %283, %288 : vector<24x24xf32>
    %c18_167 = arith.constant 18 : index
    %290 = memref.load %arg4[%c18_167] : memref<27xf32, #tpu.memory_space<smem>>
    %c2_168 = arith.constant 2 : index
    %c0_169 = arith.constant 0 : index
    %c0_170 = arith.constant 0 : index
    %291 = vector.load %arg11[%c2_168, %c0_169, %c0_170] : memref<3x26x26xf32, #tpu.memory_space<vmem>>, vector<1x24x24xf32>
    %292 = vector.shape_cast %291 : vector<1x24x24xf32> to vector<24x24xf32>
    %293 = vector.broadcast %290 : f32 to vector<24x24xf32>
    %294 = arith.mulf %292, %293 : vector<24x24xf32>
    %295 = arith.addf %289, %294 : vector<24x24xf32>
    %c19_171 = arith.constant 19 : index
    %296 = memref.load %arg4[%c19_171] : memref<27xf32, #tpu.memory_space<smem>>
    %c2_172 = arith.constant 2 : index
    %c0_173 = arith.constant 0 : index
    %c1_174 = arith.constant 1 : index
    %297 = vector.load %arg11[%c2_172, %c0_173, %c1_174] : memref<3x26x26xf32, #tpu.memory_space<vmem>>, vector<1x24x24xf32>
    %298 = vector.shape_cast %297 : vector<1x24x24xf32> to vector<24x24xf32>
    %299 = vector.broadcast %296 : f32 to vector<24x24xf32>
    %300 = arith.mulf %298, %299 : vector<24x24xf32>
    %301 = arith.addf %295, %300 : vector<24x24xf32>
    %c20_175 = arith.constant 20 : index
    %302 = memref.load %arg4[%c20_175] : memref<27xf32, #tpu.memory_space<smem>>
    %c2_176 = arith.constant 2 : index
    %c0_177 = arith.constant 0 : index
    %c2_178 = arith.constant 2 : index
    %303 = vector.load %arg11[%c2_176, %c0_177, %c2_178] : memref<3x26x26xf32, #tpu.memory_space<vmem>>, vector<1x24x24xf32>
    %304 = vector.shape_cast %303 : vector<1x24x24xf32> to vector<24x24xf32>
    %305 = vector.broadcast %302 : f32 to vector<24x24xf32>
    %306 = arith.mulf %304, %305 : vector<24x24xf32>
    %307 = arith.addf %301, %306 : vector<24x24xf32>
    %c21_179 = arith.constant 21 : index
    %308 = memref.load %arg4[%c21_179] : memref<27xf32, #tpu.memory_space<smem>>
    %c2_180 = arith.constant 2 : index
    %c1_181 = arith.constant 1 : index
    %c0_182 = arith.constant 0 : index
    %309 = vector.load %arg11[%c2_180, %c1_181, %c0_182] : memref<3x26x26xf32, #tpu.memory_space<vmem>>, vector<1x24x24xf32>
    %310 = vector.shape_cast %309 : vector<1x24x24xf32> to vector<24x24xf32>
    %311 = vector.broadcast %308 : f32 to vector<24x24xf32>
    %312 = arith.mulf %310, %311 : vector<24x24xf32>
    %313 = arith.addf %307, %312 : vector<24x24xf32>
    %c22_183 = arith.constant 22 : index
    %314 = memref.load %arg4[%c22_183] : memref<27xf32, #tpu.memory_space<smem>>
    %c2_184 = arith.constant 2 : index
    %c1_185 = arith.constant 1 : index
    %c1_186 = arith.constant 1 : index
    %315 = vector.load %arg11[%c2_184, %c1_185, %c1_186] : memref<3x26x26xf32, #tpu.memory_space<vmem>>, vector<1x24x24xf32>
    %316 = vector.shape_cast %315 : vector<1x24x24xf32> to vector<24x24xf32>
    %317 = vector.broadcast %314 : f32 to vector<24x24xf32>
    %318 = arith.mulf %316, %317 : vector<24x24xf32>
    %319 = arith.addf %313, %318 : vector<24x24xf32>
    %c23_187 = arith.constant 23 : index
    %320 = memref.load %arg4[%c23_187] : memref<27xf32, #tpu.memory_space<smem>>
    %c2_188 = arith.constant 2 : index
    %c1_189 = arith.constant 1 : index
    %c2_190 = arith.constant 2 : index
    %321 = vector.load %arg11[%c2_188, %c1_189, %c2_190] : memref<3x26x26xf32, #tpu.memory_space<vmem>>, vector<1x24x24xf32>
    %322 = vector.shape_cast %321 : vector<1x24x24xf32> to vector<24x24xf32>
    %323 = vector.broadcast %320 : f32 to vector<24x24xf32>
    %324 = arith.mulf %322, %323 : vector<24x24xf32>
    %325 = arith.addf %319, %324 : vector<24x24xf32>
    %c24_191 = arith.constant 24 : index
    %326 = memref.load %arg4[%c24_191] : memref<27xf32, #tpu.memory_space<smem>>
    %c2_192 = arith.constant 2 : index
    %c2_193 = arith.constant 2 : index
    %c0_194 = arith.constant 0 : index
    %327 = vector.load %arg11[%c2_192, %c2_193, %c0_194] : memref<3x26x26xf32, #tpu.memory_space<vmem>>, vector<1x24x24xf32>
    %328 = vector.shape_cast %327 : vector<1x24x24xf32> to vector<24x24xf32>
    %329 = vector.broadcast %326 : f32 to vector<24x24xf32>
    %330 = arith.mulf %328, %329 : vector<24x24xf32>
    %331 = arith.addf %325, %330 : vector<24x24xf32>
    %c25_195 = arith.constant 25 : index
    %332 = memref.load %arg4[%c25_195] : memref<27xf32, #tpu.memory_space<smem>>
    %c2_196 = arith.constant 2 : index
    %c2_197 = arith.constant 2 : index
    %c1_198 = arith.constant 1 : index
    %333 = vector.load %arg11[%c2_196, %c2_197, %c1_198] : memref<3x26x26xf32, #tpu.memory_space<vmem>>, vector<1x24x24xf32>
    %334 = vector.shape_cast %333 : vector<1x24x24xf32> to vector<24x24xf32>
    %335 = vector.broadcast %332 : f32 to vector<24x24xf32>
    %336 = arith.mulf %334, %335 : vector<24x24xf32>
    %337 = arith.addf %331, %336 : vector<24x24xf32>
    %c26_199 = arith.constant 26 : index
    %338 = memref.load %arg4[%c26_199] : memref<27xf32, #tpu.memory_space<smem>>
    %c2_200 = arith.constant 2 : index
    %c2_201 = arith.constant 2 : index
    %c2_202 = arith.constant 2 : index
    %339 = vector.load %arg11[%c2_200, %c2_201, %c2_202] : memref<3x26x26xf32, #tpu.memory_space<vmem>>, vector<1x24x24xf32>
    %340 = vector.shape_cast %339 : vector<1x24x24xf32> to vector<24x24xf32>
    %341 = vector.broadcast %338 : f32 to vector<24x24xf32>
    %342 = arith.mulf %340, %341 : vector<24x24xf32>
    %343 = arith.addf %337, %342 : vector<24x24xf32>
    %c0_203 = arith.constant 0 : index
    %344 = memref.load %arg5[%c0_203] : memref<1xf32, #tpu.memory_space<smem>>
    %345 = vector.broadcast %344 : f32 to vector<24x24xf32>
    %346 = arith.addf %343, %345 : vector<24x24xf32>
    %cst_204 = arith.constant 0.000000e+00 : f32
    %347 = vector.broadcast %cst_204 : f32 to vector<24x24xf32>
    %348 = arith.maximumf %346, %347 : vector<24x24xf32>
    %c0_205 = arith.constant 0 : index
    %c0_206 = arith.constant 0 : index
    %349 = vector.load %arg6[%c0_205, %c0_206] : memref<24x240xf32, #tpu.memory_space<vmem>>, vector<24x240xf32>
    %cst_207 = arith.constant dense<0.000000e+00> : vector<24x240xf32>
    %350 = tpu.matmul %348, %349, %cst_207 {dimension_numbers = #tpu.dot_dimension_numbers<[1], [0], [0], [1], [0, 0, 1, 1], [], []>} : vector<24x24xf32>, vector<24x240xf32>, vector<24x240xf32> -> vector<24x240xf32>
    %c0_208 = arith.constant 0 : index
    %c0_209 = arith.constant 0 : index
    %351 = vector.load %arg7[%c0_208, %c0_209] : memref<24x240xf32, #tpu.memory_space<vmem>>, vector<24x240xf32>
    %352 = arith.mulf %350, %351 : vector<24x240xf32>
    %c0_210 = arith.constant 0 : index
    %c0_211 = arith.constant 0 : index
    %353 = vector.load %arg8[%c0_210, %c0_211] : memref<240x10xf32, #tpu.memory_space<vmem>>, vector<240x10xf32>
    %cst_212 = arith.constant dense<0.000000e+00> : vector<24x10xf32>
    %354 = tpu.matmul %352, %353, %cst_212 {dimension_numbers = #tpu.dot_dimension_numbers<[1], [0], [0], [1], [0, 0, 1, 1], [], []>} : vector<24x240xf32>, vector<240x10xf32>, vector<24x10xf32> -> vector<24x10xf32>
    %cst_213 = arith.constant dense<0.000000e+00> : vector<10xf32>
    %355 = vector.multi_reduction <add>, %354, %cst_213 [0] : vector<24x10xf32> to vector<10xf32>
    %356 = vector.shape_cast %355 : vector<10xf32> to vector<1x10xf32>
    %c0_214 = arith.constant 0 : index
    %c0_215 = arith.constant 0 : index
    %357 = vector.load %arg9[%c0_214, %c0_215] : memref<1x10xf32, #tpu.memory_space<vmem>>, vector<1x10xf32>
    %358 = arith.addf %356, %357 : vector<1x10xf32>
    %c0_216 = arith.constant 0 : index
    %c0_217 = arith.constant 0 : index
    %c0_218 = arith.constant 0 : index
    %359 = vector.load %arg10[%c0_216, %c0_217, %c0_218] : memref<1x1x10xf32, #tpu.memory_space<vmem>>, vector<1x1x10xf32>
    %360 = vector.shape_cast %359 : vector<1x1x10xf32> to vector<1x10xf32>
    %361 = vector.shape_cast %358 : vector<1x10xf32> to vector<1x1x10xf32>
    tpu.vector_store %arg10[%c0_216, %c0_217, %c0_218], %361 {strides = array<i32>} : memref<1x1x10xf32, #tpu.memory_space<vmem>>, vector<1x1x10xf32>,
    return
  }
  func.func @transform_0(%arg0: i32) -> (i32, i32, i32) {
    %c0_i32 = arith.constant 0 : i32
    %c0_i32_0 = arith.constant 0 : i32
    %c0_i32_1 = arith.constant 0 : i32
    return %arg0, %c0_i32, %c0_i32_0 : i32, i32, i32
  }
  func.func @transform_1(%arg0: i32) -> i32 {
    %c0_i32 = arith.constant 0 : i32
    %c0_i32_0 = arith.constant 0 : i32
    return %c0_i32 : i32
  }
  func.func @transform_2(%arg0: i32) -> i32 {
    %c0_i32 = arith.constant 0 : i32
    %c0_i32_0 = arith.constant 0 : i32
    return %c0_i32 : i32
  }
  func.func @transform_3(%arg0: i32) -> i32 {
    %c0_i32 = arith.constant 0 : i32
    %c0_i32_0 = arith.constant 0 : i32
    return %c0_i32 : i32
  }
  func.func @transform_4(%arg0: i32) -> i32 {
    %c0_i32 = arith.constant 0 : i32
    %c0_i32_0 = arith.constant 0 : i32
    return %c0_i32 : i32
  }
  func.func @transform_5(%arg0: i32) -> (i32, i32) {
    %c0_i32 = arith.constant 0 : i32
    %c0_i32_0 = arith.constant 0 : i32
    %c0_i32_1 = arith.constant 0 : i32
    return %c0_i32, %c0_i32_0 : i32, i32
  }
  func.func @transform_6(%arg0: i32) -> (i32, i32) {
    %c0_i32 = arith.constant 0 : i32
    %c0_i32_0 = arith.constant 0 : i32
    %c0_i32_1 = arith.constant 0 : i32
    return %c0_i32, %c0_i32_0 : i32, i32
  }
  func.func @transform_7(%arg0: i32) -> (i32, i32) {
    %c0_i32 = arith.constant 0 : i32
    %c0_i32_0 = arith.constant 0 : i32
    %c0_i32_1 = arith.constant 0 : i32
    return %c0_i32, %c0_i32_0 : i32, i32
  }
  func.func @transform_8(%arg0: i32) -> (i32, i32) {
    %c0_i32 = arith.constant 0 : i32
    %c0_i32_0 = arith.constant 0 : i32
    %c0_i32_1 = arith.constant 0 : i32
    return %c0_i32, %c0_i32_0 : i32, i32
  }
  func.func @transform_9(%arg0: i32) -> (i32, i32, i32) {
    %c0_i32 = arith.constant 0 : i32
    %c0_i32_0 = arith.constant 0 : i32
    %c0_i32_1 = arith.constant 0 : i32
    return %arg0, %c0_i32, %c0_i32_0 : i32, i32, i32
  }
}

</mosaic_0001>

<bundles_post_ra>
// kernel: tile.9
= control target key start
LH: loop header
LB: loop body
LE: loop exit
PB: predicated region body
PF: predicated region fallthrough
CT: control target
= control target key end

     0   :  { %vm4_vm0 = vcmask 1047556   ;;  %vm26_vm1 = vcmask 64512   ;;  %s36_s18 = smov 3  ;;  %s39_s19 = smov 3  ;;  %vm6_vm2 = vcmask 80896   ;;  %vm30_vm3 = vcmask 15360   ;;  %s1046_s0 = inlined_call_operand.vmem [shape: f32[24,10,10], index: 0, kind: input, shape index: {}]   ;;  %s1047_s1 = inlined_call_operand.vmem [shape: f32[240,10], index: 1, kind: output, shape index: {}]  }
   0x1   :  { %v460_v0 = vld [vmem:[%s1046_s0 + $0xc] ss:$24 sm:$0xf]   ;;  %v469_v6 = vld [vmem:[%s1046_s0 + $0xb] ss:$24 sm:$0xf]  }
   0x2   :  { %v461_v1 = vld [vmem:[%s1046_s0 + $0xc] ss:$24 sm:$0xf0]   ;;  %v470_v7 = vld [vmem:[%s1046_s0 + $0xb] ss:$24 sm:$0xf0]  }
   0x3   :  { %v19_v2 = vsel %vm4_vm0, %v461_v1, %v460_v0  ;;  %v462_v3 = vld [vmem:[%s1046_s0 + $0xc] ss:$24 sm:$0xf]   ;;  %v56_v9 = vsel %vm4_vm0, %v470_v7, %v469_v6  ;;  %s591_s20 = smov 120   ;;  %s592_s21 = smov 110   ;;  %vm33_vm4 = vcmask 1048512  }
   0x4   :  { %v463_v4 = vld [vmem:[%s1046_s0 + $0xc] ss:$24 sm:$0xf0]   ;;  %57 = vrot.lane.b32.xlu1 %v56_v9, %s592_s21  ;;  %s62_s26 = smov 3  ;;  %s593_s4 = smov 102   ;;  %vm77_vm5 = vcmask 917296  }
   0x5   :  { %v25_v5 = vsel %vm4_vm0, %v463_v4, %v462_v3  ;;  %v465_v10 = vld [vmem:[%s1046_s0 + $0xcc] ss:$24 sm:%s36_s18]   ;;  %v473_v12 = vld [vmem:[%s1046_s0 + $0x17] ss:$24 sm:$0xf]   ;;  %s81_s5 = smov 3 }
   0x6   :  { %v27_v8 = vsel %vm26_vm1, %v25_v5, %v19_v2  ;;  %v466_v11 = vld [vmem:[%s1046_s0 + $0xcc] ss:$24 sm:%s39_s19]   ;;  %v474_v13 = vld [vmem:[%s1046_s0 + $0x17] ss:$24 sm:$0xf0]   ;;  %s99_s10 = smov 3 }
   0x7   :  { %28 = vrot.lane.b32.xlu0 %v27_v8, %s591_s20  ;;  %v42_v14 = vsel %vm26_vm1, %v466_v11, %v465_v10  ;;  %v471_v15 = vld [vmem:[%s1046_s0 + $0xcb] ss:$24 sm:%s62_s26]   ;;  %v74_v16 = vsel %vm4_vm0, %v474_v13, %v473_v12  ;;  %v478_v17 = vld [vmem:[%s1046_s0 + $0xa] ss:$24 sm:$0xf]   ;;  %s594_s15 = smov 100  }
   0x8   :  { %75 = vrot.lane.b32.xlu2 %v74_v16, %s593_s4  ;;  %v479_v18 = vld [vmem:[%s1046_s0 + $0xa] ss:$24 sm:$0xf0]   ;;  %v476_v19 = vld [vmem:[%s1046_s0 + $0xd7] ss:$24 sm:%s81_s5]   ;;  %s595_s27 = smov 92  }
   0x9   :  { %v93_v20 = vsel %vm4_vm0, %v479_v18, %v478_v17  ;;  %v480_v21 = vld [vmem:[%s1046_s0 + $0xca] ss:$24 sm:%s99_s10]   ;;  %v482_v22 = vld [vmem:[%s1046_s0 + $0x16] ss:$24 sm:$0xf]   ;;  %s596_s28 = smov 90  }
   0xa   :  { %v483_v23 = vld [vmem:[%s1046_s0 + $0x16] ss:$24 sm:$0xf0]   ;;  %v487_v24 = vld [vmem:[%s1046_s0 + $0x9] ss:$24 sm:$0xf]  }
   0xb   :  { %v488_v25 = vld [vmem:[%s1046_s0 + $0x9] ss:$24 sm:$0xf0]   ;;  %v111_v26 = vsel %vm4_vm0, %v483_v23, %v482_v22  ;;  %s136_s29 = smov 3  ;;  %s155_s5 = smov 3  ;;  %vm59_vm6 = vcmask 982896  }
   0xc   :  { %64 = vrot.lane.b32.xlu1 %v471_v15, %s592_s21  ;;  %v130_v28 = vsel %vm4_vm0, %v488_v25, %v487_v24  ;;  %v491_v29 = vld [vmem:[%s1046_s0 + $0x15] ss:$24 sm:$0xf]   ;;  %v489_v31 = vld [vmem:[%s1046_s0 + $0xc9] ss:$24 sm:%s136_s29]   ;;  %s597_s10 = smov 82  }
   0xd   :  { %v492_v30 = vld [vmem:[%s1046_s0 + $0x15] ss:$24 sm:$0xf0]   ;;  %v496_v34 = vld [vmem:[%s1046_s0 + $0x8] ss:$24 sm:$0xf]  }
   0xe   :  { %v148_v32 = vsel %vm4_vm0, %v492_v30, %v491_v29  ;;  %v494_v33 = vld [vmem:[%s1046_s0 + $0xd5] ss:$24 sm:%s155_s5]   ;;  %v497_v35 = vld [vmem:[%s1046_s0 + $0x8] ss:$24 sm:$0xf0]   ;;  %s598_s22 = smov 80  }
   0xf   :  { %43 = vrot.lane.b32.xlu0 %v42_v14, %s591_s20  ;;  %s118_s20 = smov 3  ;;  %v500_v36 = vld [vmem:[%s1046_s0 + $0x14] ss:$24 sm:$0xf]   ;;  %v167_v38 = vsel %vm4_vm0, %v497_v35, %v496_v34  ;;  %s599_s23 = smov 72   ;;  %vm114_vm7 = vcmask 835296  }
  0x10   :  { %83 = vrot.lane.b32.xlu2 %v476_v19, %s593_s4  ;;  %v485_v27 = vld [vmem:[%s1046_s0 + $0xd6] ss:$24 sm:%s118_s20]   ;;  %v501_v37 = vld [vmem:[%s1046_s0 + $0x14] ss:$24 sm:$0xf0]   ;;  %s192_s24 = smov 3 }
  0x11   :  { %v185_v40 = vsel %vm4_vm0, %v501_v37, %v500_v36  ;;  %v505_v41 = vld [vmem:[%s1046_s0 + $0x7] ss:$24 sm:$0xf]   ;;  %s210_s29 = smov 3  ;;  %v503_v43 = vld [vmem:[%s1046_s0 + $0xd4] ss:$24 sm:%s192_s24]  }
  0x12   :  { %v506_v42 = vld [vmem:[%s1046_s0 + $0x7] ss:$24 sm:$0xf0]   ;;  %s600_s5 = smov 70   ;;  %s601_s17 = smov 62   ;;  %vm96_vm8 = vcmask 900896  }
  0x13   :  { %v204_v44 = vsel %vm4_vm0, %v506_v42, %v505_v41  ;;  %v507_v45 = vld [vmem:[%s1046_s0 + $0xc7] ss:$24 sm:%s210_s29]   ;;  %v509_v46 = vld [vmem:[%s1046_s0 + $0x13] ss:$24 sm:$0xf]   ;;  %s602_s18 = smov 60  }
  0x14   :  { %101 = vrot.lane.b32.xlu1 %v480_v21, %s594_s15  ;;  %v510_v47 = vld [vmem:[%s1046_s0 + $0x13] ss:$24 sm:$0xf0]   ;;  %v514_v48 = vld [vmem:[%s1046_s0 + $0x6] ss:$24 sm:$0xf]  }
  0x15   :  { %v515_v49 = vld [vmem:[%s1046_s0 + $0x6] ss:$24 sm:$0xf0]   ;;  %v222_v50 = vsel %vm4_vm0, %v510_v47, %v509_v46  ;;  %s247_s19 = smov 3  ;;  %s266_s20 = smov 3  ;;  %vm133_vm9 = vcmask 818896  }
  0x16   :  { %v241_v52 = vsel %vm4_vm0, %v515_v49, %v514_v48  ;;  %v518_v53 = vld [vmem:[%s1046_s0 + $0x12] ss:$24 sm:$0xf]   ;;  %v516_v55 = vld [vmem:[%s1046_s0 + $0xc6] ss:$24 sm:%s247_s19]   ;;  %s603_s29 = smov 52  }
  0x17   :  { %94 = vrot.lane.b32.xlu0 %v93_v20, %s594_s15  ;;  %s173_s15 = smov 3  ;;  %v519_v54 = vld [vmem:[%s1046_s0 + $0x12] ss:$24 sm:$0xf0]   ;;  %s604_s12 = smov 50   ;;  %vm170_vm10 = vcmask 736896  }
  0x18   :  { %112 = vrot.lane.b32.xlu2 %v111_v26, %s595_s27  ;;  %v498_v39 = vld [vmem:[%s1046_s0 + $0xc8] ss:$24 sm:%s173_s15]   ;;  %v259_v56 = vsel %vm4_vm0, %v519_v54, %v518_v53  ;;  %v523_v58 = vld [vmem:[%s1046_s0 + $0x5] ss:$24 sm:$0xf]   ;;  %s605_s13 = smov 42  }
  0x19   :  { %v521_v57 = vld [vmem:[%s1046_s0 + $0xd2] ss:$24 sm:%s266_s20]   ;;  %v524_v59 = vld [vmem:[%s1046_s0 + $0x5] ss:$24 sm:$0xf0]   ;;  %s303_s14 = smov 3 }
  0x1a   :  { %v527_v60 = vld [vmem:[%s1046_s0 + $0x11] ss:$24 sm:$0xf]   ;;  %v278_v62 = vsel %vm4_vm0, %v524_v59, %v523_v58  ;;  %s321_s15 = smov 3  ;;  %s340_s2 = smov 3  ;;  %vm151_vm11 = vcmask 753296  }
  0x1b   :  { %v528_v61 = vld [vmem:[%s1046_s0 + $0x11] ss:$24 sm:$0xf0]   ;;  %v532_v1 = vld [vmem:[%s1046_s0 + $0x4] ss:$24 sm:$0xf]  }
  0x1c   :  { %131 = vrot.lane.b32.xlu1 %v130_v28, %s596_s28  ;;  %v296_v0 = vsel %vm4_vm0, %v528_v61, %v527_v60  ;;  %v533_v2 = vld [vmem:[%s1046_s0 + $0x4] ss:$24 sm:$0xf0]   ;;  %v530_v3 = vld [vmem:[%s1046_s0 + $0xd1] ss:$24 sm:%s303_s14]   ;;  %s9_s14 = smov 3 }
  0x1d   :  { %v315_v4 = vsel %vm4_vm0, %v533_v2, %v532_v1  ;;  %v534_v5 = vld [vmem:[%s1046_s0 + $0xc4] ss:$24 sm:%s321_s15]   ;;  %v536_v6 = vld [vmem:[%s1046_s0 + $0x10] ss:$24 sm:$0xf]   ;;  %s608_s15 = smov 30  }
  0x1e   :  { %v537_v7 = vld [vmem:[%s1046_s0 + $0x10] ss:$24 sm:$0xf0]   ;;  %v541_v10 = vld [vmem:[%s1046_s0 + $0x3] ss:$24 sm:$0xf]  }
  0x1f   :  { %120 = vrot.lane.b32.xlu0 %v485_v27, %s595_s27  ;;  %v2_v8 = vld [vmem:[%s1046_s0] ss:$24 sm:$0xf]   ;;  %v542_v11 = vld [vmem:[%s1046_s0 + $0x3] ss:$24 sm:$0xf0]   ;;  %v333_v13 = vsel %vm4_vm0, %v537_v7, %v536_v6 }
  0x20   :  { %138 = vrot.lane.b32.xlu2 %v489_v31, %s596_s28  ;;  %s606_s28 = smov 40   ;;  %v3_v9 = vld [vmem:[%s1046_s0] ss:$24 sm:$0xf0]   ;;  %v352_v15 = vsel %vm4_vm0, %v542_v11, %v541_v10  ;;  %s358_s16 = smov 3  ;;  %vm188_vm12 = vcmask 671296  }
  0x21   :  { %v5_v12 = vsel %vm4_vm0, %v3_v9, %v2_v8  ;;  %v539_v14 = vld [vmem:[%s1046_s0 + $0xd0] ss:$24 sm:%s340_s2]   ;;  %v545_v16 = vld [vmem:[%s1046_s0 + $0xf] ss:$24 sm:$0xf]   ;;  %s377_s21 = smov 3 }
  0x22   :  { %7 = vst.msk [vmem:[%s1047_s1] sm:$0xff] %vm6_vm2, %v5_v12   ;;  %v546_v17 = vld [vmem:[%s1046_s0 + $0xf] ss:$24 sm:$0xf0]   ;;  %v458_v18 = vld [vmem:[%s1046_s0 + $0xc0] ss:$24 sm:%s9_s14]  }
  0x23   :  { %v543_v19 = vld [vmem:[%s1046_s0 + $0xc3] ss:$24 sm:%s358_s16]   ;;  %459 = vst.msk [vmem:[%s1047_s1 + $0x10] sm:$0x3] %vm6_vm2, %v458_v18   ;;  %v370_v20 = vsel %vm4_vm0, %v546_v17, %v545_v16  ;;  %s609_s30 = smov 22   ;;  %s395_s6 = smov 3 }
  0x24   :  { %157 = vrot.lane.b32.xlu1 %v494_v33, %s597_s10  ;;  %v548_v21 = vld [vmem:[%s1046_s0 + $0xcf] ss:$24 sm:%s377_s21]   ;;  %v550_v23 = vld [vmem:[%s1046_s0 + $0x2] ss:$24 sm:$0xf]   ;;  %s611_s14 = smov 12  }
  0x25   :  { %v551_v24 = vld [vmem:[%s1046_s0 + $0x2] ss:$24 sm:$0xf0]   ;;  %v554_v25 = vld [vmem:[%s1046_s0 + $0xe] ss:$24 sm:$0xf]  }
  0x26   :  { %v555_v26 = vld [vmem:[%s1046_s0 + $0xe] ss:$24 sm:$0xf0]   ;;  %v389_v27 = vsel %vm4_vm0, %v551_v24, %v550_v23  ;;  %v552_v28 = vld [vmem:[%s1046_s0 + $0xc2] ss:$24 sm:%s395_s6]   ;;  %s432_s16 = smov 3 }
  0x27   :  { %149 = vrot.lane.b32.xlu0 %v148_v32, %s597_s10  ;;  %s229_s10 = smov 3  ;;  %v407_v29 = vsel %vm4_vm0, %v555_v26, %v554_v25  ;;  %v559_v31 = vld [vmem:[%s1046_s0 + $0x1] ss:$24 sm:$0xf]   ;;  %s612_s25 = smov 10   ;;  %vm225_vm13 = vcmask 589296  }
  0x28   :  { %168 = vrot.lane.b32.xlu2 %v167_v38, %s598_s22  ;;  %v512_v51 = vld [vmem:[%s1046_s0 + $0xd3] ss:$24 sm:%s229_s10]   ;;  %v560_v32 = vld [vmem:[%s1046_s0 + $0x1] ss:$24 sm:$0xf0]   ;;  %s613_s11 = smov 2  }
  0x29   :  { %v426_v34 = vsel %vm4_vm0, %v560_v32, %v559_v31  ;;  %v561_v35 = vld [vmem:[%s1046_s0 + $0xc1] ss:$24 sm:%s432_s16]   ;;  %v563_v37 = vld [vmem:[%s1046_s0 + $0xd] ss:$24 sm:$0xf]   ;;  %vm207_vm14 = vcmask 654896  }
  0x2a   :  { %v564_v38 = vld [vmem:[%s1046_s0 + $0xd] ss:$24 sm:$0xf0]   ;;  %vm244_vm15 = vcmask 572896   ;;  %vm262_vm1 = vcmask 507296   ;;  %vm299_vm2 = vcmask 425296  }
  0x2b   :  { %v444_v41 = vsel %vm4_vm0, %v564_v38, %v563_v37  ;;  %vm281_vm0 = vcmask 490896  }
  0x2c   :  { %186 = vrot.lane.b32.xlu1 %v185_v40, %s599_s23 }
  0x2f   :  { %175 = vrot.lane.b32.xlu0 %v498_v39, %s598_s22 }
  0x30   :  { %194 = vrot.lane.b32.xlu2 %v503_v43, %s599_s23 }
  0x34   :  { %212 = vrot.lane.b32.xlu1 %v507_v45, %s600_s5 }
  0x37   :  { %205 = vrot.lane.b32.xlu0 %v204_v44, %s600_s5  ;;  %s284_s5 = smov 3 }
  0x38   :  { %223 = vrot.lane.b32.xlu2 %v222_v50, %s601_s17  ;;  %v525_v63 = vld [vmem:[%s1046_s0 + $0xc5] ss:$24 sm:%s284_s5]  }
  0x3c   :  { %242 = vrot.lane.b32.xlu1 %v241_v52, %s602_s18 }
  0x3f   :  { %231 = vrot.lane.b32.xlu0 %v512_v51, %s601_s17 }
  0x40   :  { %249 = vrot.lane.b32.xlu2 %v516_v55, %s602_s18 }
  0x44   :  { %268 = vrot.lane.b32.xlu1 %v521_v57, %s603_s29 }
  0x47   :  { %260 = vrot.lane.b32.xlu0 %v259_v56, %s603_s29 }
  0x48   :  { %279 = vrot.lane.b32.xlu2 %v278_v62, %s604_s12 }
  0x4c   :  { %297 = vrot.lane.b32.xlu1 %v296_v0, %s605_s13 }
  0x4f   :  { %286 = vrot.lane.b32.xlu0 %v525_v63, %s604_s12 }
  0x50   :  { %305 = vrot.lane.b32.xlu2 %v530_v3, %s605_s13  ;;  %s607_s13 = smov 32  }
  0x54   :  { %323 = vrot.lane.b32.xlu1 %v534_v5, %s606_s28 }
  0x57   :  { %316 = vrot.lane.b32.xlu0 %v315_v4, %s606_s28 }
  0x58   :  { %334 = vrot.lane.b32.xlu2 %v333_v13, %s607_s13 }
  0x5c   :  { %353 = vrot.lane.b32.xlu1 %v352_v15, %s608_s15 }
  0x5f   :  { %342 = vrot.lane.b32.xlu0 %v539_v14, %s607_s13  ;;  %s610_s13 = smov 20  }
  0x60   :  { %360 = vrot.lane.b32.xlu2 %v543_v19, %s608_s15  ;;  %s414_s15 = smov 3 }
  0x61   :  { %v557_v33 = vld [vmem:[%s1046_s0 + $0xce] ss:$24 sm:%s414_s15]  }
  0x62   :  { %v76_v22 = vpop.permute.xlu2 %75  }
  0x64   :  { %379 = vrot.lane.b32.xlu1 %v548_v21, %s609_s30 }
  0x67   :  { %371 = vrot.lane.b32.xlu0 %v370_v20, %s609_s30  ;;  %s451_s30 = smov 3 }
  0x68   :  { %390 = vrot.lane.b32.xlu2 %v389_v27, %s610_s13  ;;  %v566_v42 = vld [vmem:[%s1046_s0 + $0xcd] ss:$24 sm:%s451_s30]  }
  0x6a   :  { %v84_v30 = vpop.permute.xlu2 %83  }
  0x6c   :  { %408 = vrot.lane.b32.xlu1 %v407_v29, %s611_s14 }
  0x6f   :  { %397 = vrot.lane.b32.xlu0 %v552_v28, %s610_s13 }
  0x70   :  { %416 = vrot.lane.b32.xlu2 %v557_v33, %s611_s14 }
  0x72   :  { %v113_v36 = vpop.permute.xlu2 %112  }
  0x74   :  { %434 = vrot.lane.b32.xlu1 %v561_v35, %s612_s25 }
  0x76   :  { %v58_v40 = vpop.permute.xlu1 %57  }
  0x77   :  { %427 = vrot.lane.b32.xlu0 %v426_v34, %s612_s25 }
  0x78   :  { %445 = vrot.lane.b32.xlu2 %v444_v41, %s613_s11 }
  0x79   :  { %v29_v39 = vpop.permute.xlu0 %28  }
  0x7a   :  { %464 = vst.msk [vmem:[%s1047_s1 + $0x8] sm:$0xff] %vm30_vm3, %v29_v39   ;;  %v139_v43 = vpop.permute.xlu2 %138  }
  0x7b   :  { %34 = vst.msk [vmem:[%s1047_s1] sm:$0xff] %vm33_vm4, %v29_v39  }
  0x7c   :  { %475 = vst.msk [vmem:[%s1047_s1 + $0x8] sm:$0xff] %vm77_vm5, %v76_v22  }
  0x7d   :  { %60 = vst.msk [vmem:[%s1047_s1] sm:$0xff] %vm59_vm6, %v58_v40  }
  0x7e   :  { %484 = vst.msk [vmem:[%s1047_s1 + $0x8] sm:$0xff] %vm114_vm7, %v113_v36   ;;  %v65_v45 = vpop.permute.xlu1 %64  }
  0x7f   :  { %453 = vrot.lane.b32.xlu0 %v566_v42, %s613_s11 }
  0x81   :  { %v44_v44 = vpop.permute.xlu0 %43  }
  0x82   :  { %467 = vst.msk [vmem:[%s1047_s1 + $0x18] sm:$0x3] %vm30_vm3, %v44_v44   ;;  %v169_v46 = vpop.permute.xlu2 %168   ;;  %vm336_vm3 = vcmask 343296  }
  0x83   :  { %468 = vst.msk [vmem:[%s1047_s1 + $0x10] sm:$0x3] %vm33_vm4, %v44_v44   ;;  %vm318_vm4 = vcmask 408896  }
  0x84   :  { %477 = vst.msk [vmem:[%s1047_s1 + $0x18] sm:$0x3] %vm77_vm5, %v84_v30   ;;  %vm355_vm5 = vcmask 326896  }
  0x85   :  { %472 = vst.msk [vmem:[%s1047_s1 + $0x10] sm:$0x3] %vm59_vm6, %v65_v45   ;;  %vm392_vm6 = vcmask 244896  }
  0x86   :  { %v102_v48 = vpop.permute.xlu1 %101  }
  0x87   :  { %481 = vst.msk [vmem:[%s1047_s1 + $0x10] sm:$0x3] %vm96_vm8, %v102_v48  }
  0x88   :  { %490 = vst.msk [vmem:[%s1047_s1 + $0x10] sm:$0x3] %vm133_vm9, %v139_v43  }
  0x89   :  { %v95_v47 = vpop.permute.xlu0 %94  }
  0x8a   :  { %97 = vst.msk [vmem:[%s1047_s1] sm:$0xff] %vm96_vm8, %v95_v47   ;;  %v195_v49 = vpop.permute.xlu2 %194   ;;  %vm410_vm8 = vcmask 179296  }
  0x8e   :  { %v132_v51 = vpop.permute.xlu1 %131  }
  0x8f   :  { %134 = vst.msk [vmem:[%s1047_s1] sm:$0xff] %vm133_vm9, %v132_v51   ;;  %vm447_vm9 = vcmask 97296  }
  0x90   :  { %171 = vst.msk [vmem:[%s1047_s1] sm:$0xff] %vm170_vm10, %v169_v46  }
  0x91   :  { %v121_v50 = vpop.permute.xlu0 %120  }
  0x92   :  { %486 = vst.msk [vmem:[%s1047_s1 + $0x18] sm:$0x3] %vm114_vm7, %v121_v50   ;;  %v224_v52 = vpop.permute.xlu2 %223   ;;  %vm373_vm7 = vcmask 261296  }
  0x96   :  { %v158_v54 = vpop.permute.xlu1 %157  }
  0x97   :  { %495 = vst.msk [vmem:[%s1047_s1 + $0x18] sm:$0x3] %vm151_vm11, %v158_v54  }
  0x98   :  { %504 = vst.msk [vmem:[%s1047_s1 + $0x18] sm:$0x3] %vm188_vm12, %v195_v49  }
  0x99   :  { %v150_v53 = vpop.permute.xlu0 %149  }
  0x9a   :  { %493 = vst.msk [vmem:[%s1047_s1 + $0x8] sm:$0xff] %vm151_vm11, %v150_v53   ;;  %v250_v55 = vpop.permute.xlu2 %249  }
  0x9e   :  { %v187_v57 = vpop.permute.xlu1 %186  }
  0x9f   :  { %502 = vst.msk [vmem:[%s1047_s1 + $0x8] sm:$0xff] %vm188_vm12, %v187_v57  }
  0xa0   :  { %511 = vst.msk [vmem:[%s1047_s1 + $0x8] sm:$0xff] %vm225_vm13, %v224_v52  }
  0xa1   :  { %v176_v56 = vpop.permute.xlu0 %175  }
  0xa2   :  { %499 = vst.msk [vmem:[%s1047_s1 + $0x10] sm:$0x3] %vm170_vm10, %v176_v56   ;;  %v280_v58 = vpop.permute.xlu2 %279   ;;  %vm429_vm10 = vcmask 162896  }
  0xa6   :  { %v213_v60 = vpop.permute.xlu1 %212  }
  0xa7   :  { %508 = vst.msk [vmem:[%s1047_s1 + $0x10] sm:$0x3] %vm207_vm14, %v213_v60  }
  0xa8   :  { %517 = vst.msk [vmem:[%s1047_s1 + $0x10] sm:$0x3] %vm244_vm15, %v250_v55  }
  0xa9   :  { %v206_v59 = vpop.permute.xlu0 %205  }
  0xaa   :  { %208 = vst.msk [vmem:[%s1047_s1] sm:$0xff] %vm207_vm14, %v206_v59   ;;  %v306_v61 = vpop.permute.xlu2 %305  }
  0xae   :  { %v243_v63 = vpop.permute.xlu1 %242  }
  0xaf   :  { %245 = vst.msk [vmem:[%s1047_s1] sm:$0xff] %vm244_vm15, %v243_v63  }
  0xb0   :  { %282 = vst.msk [vmem:[%s1047_s1] sm:$0xff] %vm281_vm0, %v280_v58  }
  0xb1   :  { %v232_v62 = vpop.permute.xlu0 %231  }
  0xb2   :  { %513 = vst.msk [vmem:[%s1047_s1 + $0x18] sm:$0x3] %vm225_vm13, %v232_v62   ;;  %v335_v0 = vpop.permute.xlu2 %334  }
  0xb6   :  { %v269_v2 = vpop.permute.xlu1 %268  }
  0xb7   :  { %522 = vst.msk [vmem:[%s1047_s1 + $0x18] sm:$0x3] %vm262_vm1, %v269_v2  }
  0xb8   :  { %531 = vst.msk [vmem:[%s1047_s1 + $0x18] sm:$0x3] %vm299_vm2, %v306_v61  }
  0xb9   :  { %v261_v1 = vpop.permute.xlu0 %260  }
  0xba   :  { %520 = vst.msk [vmem:[%s1047_s1 + $0x8] sm:$0xff] %vm262_vm1, %v261_v1   ;;  %v361_v3 = vpop.permute.xlu2 %360  }
  0xbe   :  { %v298_v5 = vpop.permute.xlu1 %297  }
  0xbf   :  { %529 = vst.msk [vmem:[%s1047_s1 + $0x8] sm:$0xff] %vm299_vm2, %v298_v5  }
  0xc0   :  { %538 = vst.msk [vmem:[%s1047_s1 + $0x8] sm:$0xff] %vm336_vm3, %v335_v0  }
  0xc1   :  { %v287_v4 = vpop.permute.xlu0 %286  }
  0xc2   :  { %526 = vst.msk [vmem:[%s1047_s1 + $0x10] sm:$0x3] %vm281_vm0, %v287_v4   ;;  %v391_v6 = vpop.permute.xlu2 %390  }
  0xc6   :  { %v324_v8 = vpop.permute.xlu1 %323  }
  0xc7   :  { %535 = vst.msk [vmem:[%s1047_s1 + $0x10] sm:$0x3] %vm318_vm4, %v324_v8  }
  0xc8   :  { %544 = vst.msk [vmem:[%s1047_s1 + $0x10] sm:$0x3] %vm355_vm5, %v361_v3  }
  0xc9   :  { %v317_v7 = vpop.permute.xlu0 %316  }
  0xca   :  { %319 = vst.msk [vmem:[%s1047_s1] sm:$0xff] %vm318_vm4, %v317_v7   ;;  %v417_v9 = vpop.permute.xlu2 %416  }
  0xce   :  { %v354_v11 = vpop.permute.xlu1 %353  }
  0xcf   :  { %356 = vst.msk [vmem:[%s1047_s1] sm:$0xff] %vm355_vm5, %v354_v11  }
  0xd0   :  { %393 = vst.msk [vmem:[%s1047_s1] sm:$0xff] %vm392_vm6, %v391_v6  }
  0xd1   :  { %v343_v10 = vpop.permute.xlu0 %342  }
  0xd2   :  { %540 = vst.msk [vmem:[%s1047_s1 + $0x18] sm:$0x3] %vm336_vm3, %v343_v10   ;;  %v446_v12 = vpop.permute.xlu2 %445  }
  0xd6   :  { %v380_v14 = vpop.permute.xlu1 %379  }
  0xd7   :  { %549 = vst.msk [vmem:[%s1047_s1 + $0x18] sm:$0x3] %vm373_vm7, %v380_v14  }
  0xd8   :  { %558 = vst.msk [vmem:[%s1047_s1 + $0x18] sm:$0x3] %vm410_vm8, %v417_v9  }
  0xd9   :  { %v372_v13 = vpop.permute.xlu0 %371  }
  0xda   :  { %547 = vst.msk [vmem:[%s1047_s1 + $0x8] sm:$0xff] %vm373_vm7, %v372_v13  }
  0xde   :  { %v409_v16 = vpop.permute.xlu1 %408  }
  0xdf   :  { %556 = vst.msk [vmem:[%s1047_s1 + $0x8] sm:$0xff] %vm410_vm8, %v409_v16  }
  0xe0   :  { %565 = vst.msk [vmem:[%s1047_s1 + $0x8] sm:$0xff] %vm447_vm9, %v446_v12  }
  0xe1   :  { %v398_v15 = vpop.permute.xlu0 %397  }
  0xe2   :  { %553 = vst.msk [vmem:[%s1047_s1 + $0x10] sm:$0x3] %vm392_vm6, %v398_v15  }
  0xe6   :  { %v435_v18 = vpop.permute.xlu1 %434  }
  0xe7   :  { %562 = vst.msk [vmem:[%s1047_s1 + $0x10] sm:$0x3] %vm429_vm10, %v435_v18  }
  0xe9   :  { %v428_v17 = vpop.permute.xlu0 %427  }
  0xea   :  { %430 = vst.msk [vmem:[%s1047_s1] sm:$0xff] %vm429_vm10, %v428_v17  }
  0xf1   :  { %v454_v19 = vpop.permute.xlu0 %453  }
  0xf2   :  { %567 = vst.msk [vmem:[%s1047_s1 + $0x18] sm:$0x3] %vm447_vm9, %v454_v19  }

// kernel: conv_model_forward.1
= control target key start
LH: loop header
LB: loop body
LE: loop exit
PB: predicated region body
PF: predicated region fallthrough
CT: control target
= control target key end

     0   :  { %s3150_s0 = inlined_call_operand.vmem [shape: f32[2,28,28], index: 0, kind: input, shape index: {}]   ;;  %s3151_s1 = inlined_call_operand.vmem [shape: f32[27], index: 1, kind: input, shape index: {}]   ;;  %s3152_s2 = inlined_call_operand.vmem [shape: f32[3], index: 2, kind: input, shape index: {}]   ;;  %s3153_s3 = inlined_call_operand.vmem [shape: f32[27], index: 3, kind: input, shape index: {}]   ;;  %s3154_s4 = inlined_call_operand.<no memory space> [shape: f32[1], index: 4, kind: input, shape index: {}]   ;;  %s3155_s5 = inlined_call_operand.vmem [shape: f32[24,240], index: 5, kind: input, shape index: {}]   ;;  %s3156_s6 = inlined_call_operand.vmem [shape: f32[24,240], index: 6, kind: input, shape index: {}]   ;;  %s3157_s7 = inlined_call_operand.vmem [shape: f32[240,10], index: 7, kind: input, shape index: {}]   ;;  %s3158_s8 = inlined_call_operand.vmem [shape: f32[1,10], index: 8, kind: input, shape index: {}]   ;;  %s3159_s9 = inlined_call_operand.hbm [shape: f32[2,1,10], index: 9, kind: output, shape index: {}]  }
   0x1   :  { %14 = sst [smem:[#allocation3]] %s3154_s4 }
   0x2   :  { %15 = vsyncpa [#allocation6], 0 }
   0x3   :  { %16 = vsyncpa [#allocation8], 0 }
   0x4   :  { %17 = vsyncpa [#allocation5], 0 }
   0x5   :  { %19 = vsyncpa [#allocation5 + $0x1], 0  ;;  %s2104_s11 = smov 0   ;;  %s2106_s12 = smov 0  }
   0x6   :  { %s2108_s13 = smov 0   ;;  %s2110_s14 = smov 0  }
   0x7 LB: > { %s2125_s4 = sadd.s32 4294967295, %s2044_s14   ;;  %s1749_s15 = sadd.s32 4294967294, %s2044_s14   ;;  %s2044_s14 = sphi %s2110_s14, %s3166_s14   ;;  %s2040_s13 = sphi %s2108_s13, %s3165_s13   ;;  %s2036_s12 = sphi %s2106_s12, %s3164_s12   ;;  %s2032_s11 = sphi %s2104_s11, %s3163_s11  }
   0x8   : > { %s2129_s16 = sadd.s32 1, %s2044_s14   ;;  %s226_s17 = sadd.s32 1, %s2040_s13 }
   0x9   : > { %s223_s18 = ssub.s32 %s2044_s14, %s2129_s16  ;;  %p236_p0 = scmp.ne.s32.totalorder %s2040_s13, %s2036_s12 }
   0xa   : > { %p224_p1 = scmp.eq.s32.totalorder %s223_s18, 0  ;;  %p237_p2 = scmp.eq.s32.totalorder %s2125_s4, 1 }
   0xb   : > { %p242_p3 = scmp.ne.s32.totalorder %s2036_s12, %s2032_s11  ;;  %p243_p4 = scmp.eq.s32.totalorder %s1749_s15, 1 }
   0xc   : > { %s2140_s19 = scalar_select %p224_p1, %s2040_s13, %s226_s17  }
   0xd   : > { %p2142_p5 = por %p237_p2, %p236_p0  ;;  %p2146_p6 = por %p243_p4, %p242_p3 }
   0xe   : > { %p1750_p7 = scmp.ge.s32.totalorder %s2044_s14, 1  ;;  %p250_p8 = scmp.lt.s32.totalorder %s2044_s14, 3 }
   0xf   : > { %p1885_p9 = scmp.eq.s32.totalorder %s2125_s4, 0  ;;  %s272_s25 = sshll.u32 %s3152_s2, 4  ;;  %s273_s25 = int_to_ptr.vmem [resolvable:$true] %s272_s25 }
  0x10   : > { %p2153_p10 = pnand %p1750_p7, %p250_p8  ;;  %s262_s28 = sshll.u32 %s3151_s1, 4  ;;  %s263_s28 = int_to_ptr.vmem [resolvable:$true] %s262_s28 }
  0x11   : > { %s282_s10 = sshll.u32 %s3153_s3, 4  ;;  %s2046_s15 = smov [#allocation7]   ;;  %s283_s10 = int_to_ptr.vmem [resolvable:$true] %s282_s10 }
  0x12   : > { %p1871_p11 = pneg %p2153_p10  ;;  %s2047_s17 = smov [#allocation4]  }
  0x13   : > { %s2048_s18 = smov [#allocation9]  }
  0x14   : > { %p1872_p12 = pnand %p1885_p9, %p1871_p11  ;;  %318 = sbr.rel (%p2153_p10) target bundleno = 788 (0x314), region = 56 }
  0x16   : > { %1877 = dma.vmem_to_smem (!%p1872_p12), %s273_s25, 16, %s2046_s15, [#allocation8]  }
  0x17   : > { %1874 = dma.vmem_to_smem (!%p1872_p12), %s263_s28, 16, %s2047_s17, [#allocation6]  }
  0x18   : > { %1880 = dma.vmem_to_smem (!%p1872_p12), %s283_s10, 16, %s2048_s18, [#allocation8]  }
  0x19   : > { %2019 = dma.done.wait (%p1885_p9), [#allocation6], 16  }
  0x1a   : > { %2021 = vsyncadd (%p1885_p9), [#allocation6], 4294967280 }
  0x1b   : > { %2023 = dma.done.wait (%p1885_p9), [#allocation8], 32  }
  0x1c   : > { %2025 = vsyncadd (%p1885_p9), [#allocation8], 4294967264 }
  0x1d   : > { %335 = sfence }
  0x1e   : > { %p365_p13 = scmp.lt.s32.totalorder %s2125_s4, 1  ;;  %s1762_s23 = sld [smem:[#allocation4 + $0x2]]  ;;  %vm574_vm0 = vcmask 211968   ;;  %vm578_vm1 = vcmask 205824   ;;  %vm1468_vm2 = vcmask 195584   ;;  %vm1572_vm3 = vcmask 916480  }
  0x1f   : > { %s1761_s24 = sld [smem:[#allocation4 + $0x1]]  ;;  %s2049_s10 = smov 126   ;;  %vm1634_vm4 = vcmask 80896   ;;  %vm1648_vm5 = vcmask 73728  }
  0x20   : > { %s366_s22 = scalar_select %p365_p13, %s2125_s4, 1 }
  0x21   : > { %s1765_s25 = sld [smem:[#allocation4 + $0x5]]  ;;  %s2050_s15 = smov 127  }
  0x22   : > { %s1826_s26 = sshll.u32 %s366_s22, 5  ;;  %s1764_s27 = sld [smem:[#allocation4 + $0x4]] }
  0x23   : > { %s2185_s30 = scalar_lea.vmem %s3150_s0, %s1826_s26  ;;  %s1767_s17 = sld [smem:[#allocation4 + $0x7]] }
  0x24   : > { %v2188_v0 = vld [vmem:[%s2185_s30 + $0x8] sm:$0xff]  ;;  %v407_v1 = vstv %s1762_s23  ;;  %v2191_v2 = vld [vmem:[%s2185_s30] sm:$0xff]  ;;  %v2215_v13 = vld [vmem:[%s2185_s30 + $0x10] sm:$0xff]  ;;  %s1768_s18 = sld [smem:[#allocation4 + $0x8]] }
  0x25   : > { %v409_v3 = vmul.f32 %v407_v1, %v2188_v0  ;;  %v381_v4 = vstv %s1761_s24  ;;  %v2200_v7 = vld [vmem:[%s2185_s30 + $0x1] sm:$0xff]  ;;  %v408_v12 = vmul.f32 %v407_v1, %v2191_v2  ;;  %v2223_v16 = vld [vmem:[%s2185_s30 + $0x9] sm:$0xff]  ;;  %s1770_s23 = sld [smem:[#allocation4 + $0xa]]  ;;  %v410_v21 = vmul.f32 %v407_v1, %v2215_v13  ;;  %v2244_v24 = vld [vmem:[%s2185_s30 + $0x11] sm:$0xff] }
  0x26   : > { %v383_v5 = vmul.f32 %v381_v4, %v2188_v0  ;;  %v382_v6 = vmul.f32 %v381_v4, %v2191_v2  ;;  %v2218_v14 = vld [vmem:[%s2185_s30 + $0x2] sm:$0xff]  ;;  %v384_v17 = vmul.f32 %v381_v4, %v2215_v13  ;;  %v2249_v26 = vld [vmem:[%s2185_s30 + $0xa] sm:$0xff]  ;;  %s1771_s24 = sld [smem:[#allocation4 + $0xb]]  ;;  %v2261_v30 = vld [vmem:[%s2185_s30 + $0x18] sm:$0x3] }
  0x27   : > { %418 = vrot.lane.b32.xlu2 %v409_v3, %s2049_s10  ;;  %v2202_v8 = vstv %s1765_s25  ;;  %v385_v32 = vmul.f32 %v381_v4, %v2261_v30  ;;  %s1773_s22 = sld [smem:[#allocation4 + $0xd]]  ;;  %v411_v36 = vmul.f32 %v407_v1, %v2261_v30  ;;  %v2282_v38 = vld [vmem:[%s2185_s30 + $0x12] sm:$0xff]  ;;  %v2332_v56 = vld [vmem:[%s2185_s30 + $0x1a] sm:$0x3] }
  0x28   : > { %392 = vrot.lane.b32.xlu1 %v383_v5, %s2050_s15  ;;  %390 = vrot.lane.b32.xlu0 %v382_v6, %s2050_s15  ;;  %v2204_v9 = vstv %s1764_s27  ;;  %v474_v10 = vmul.f32 %v2202_v8, %v2200_v7  ;;  %v475_v23 = vmul.f32 %v2202_v8, %v2223_v16  ;;  %v476_v37 = vmul.f32 %v2202_v8, %v2244_v24  ;;  %s1774_s25 = sld [smem:[#allocation4 + $0xe]]  ;;  %v2296_v43 = vld [vmem:[%s2185_s30 + $0x19] sm:$0x3] }
  0x29   : > { %v448_v11 = vmul.f32 %v2204_v9, %v2200_v7  ;;  %v2220_v15 = vstv %s1767_s17  ;;  %v449_v19 = vmul.f32 %v2204_v9, %v2223_v16  ;;  %v450_v27 = vmul.f32 %v2204_v9, %v2244_v24  ;;  %s1776_s26 = sld [smem:[#allocation4 + $0x10]]  ;;  %v2357_v3 = vld [vmem:[%s2185_s30 + $0x18] sm:$0x3] }
  0x2a   : > { %v514_v18 = vmul.f32 %v2220_v15, %v2218_v14  ;;  %v2233_v20 = vstv %s1768_s18  ;;  %v515_v29 = vmul.f32 %v2220_v15, %v2249_v26  ;;  %v516_v41 = vmul.f32 %v2220_v15, %v2282_v38  ;;  %s1777_s27 = sld [smem:[#allocation4 + $0x11]] }
  0x2b   : > { %v540_v22 = vmul.f32 %v2233_v20, %v2218_v14  ;;  %v2246_v25 = vstv %s1770_s23  ;;  %v541_v34 = vmul.f32 %v2233_v20, %v2249_v26  ;;  %v542_v45 = vmul.f32 %v2233_v20, %v2282_v38  ;;  %s1780_s28 = sld [smem:[#allocation4 + $0x13]] }
  0x2c   : > { %v592_v28 = vmul.f32 %v2246_v25, %v2191_v2  ;;  %v2263_v31 = vstv %s1771_s24  ;;  %v593_v35 = vmul.f32 %v2246_v25, %v2188_v0  ;;  %v451_v46 = vmul.f32 %v2204_v9, %v2296_v43  ;;  %s1781_s29 = sld [smem:[#allocation4 + $0x14]] }
  0x2d   : > { %v618_v33 = vmul.f32 %v2263_v31, %v2191_v2  ;;  %v2284_v39 = vstv %s1773_s22  ;;  %v619_v40 = vmul.f32 %v2263_v31, %v2188_v0  ;;  %v477_v51 = vmul.f32 %v2202_v8, %v2296_v43  ;;  %s1783_s17 = sld [smem:[#allocation4 + $0x16]] }
  0x2e   : > { %v658_v42 = vmul.f32 %v2284_v39, %v2200_v7  ;;  %v2298_v44 = vstv %s1774_s25  ;;  %v659_v50 = vmul.f32 %v2284_v39, %v2223_v16  ;;  %v594_v55 = vmul.f32 %v2246_v25, %v2215_v13  ;;  %s370_s18 = sld [smem:[#allocation4]] }
  0x2f   : > { %482 = vrot.lane.b32.xlu2 %v474_v10, %s2049_s10  ;;  %v684_v47 = vmul.f32 %v2298_v44, %v2200_v7  ;;  %v2309_v48 = vstv %s1776_s26  ;;  %v685_v54 = vmul.f32 %v2298_v44, %v2223_v16  ;;  %v543_v57 = vmul.f32 %v2233_v20, %v2332_v56  ;;  %s1763_s23 = sld [smem:[#allocation4 + $0x3]] }
  0x30   : > { %456 = vrot.lane.b32.xlu1 %v448_v11, %s2050_s15  ;;  %416 = vrot.lane.b32.xlu0 %v408_v12, %s2049_s10  ;;  %v724_v49 = vmul.f32 %v2309_v48, %v2218_v14  ;;  %v2320_v52 = vstv %s1777_s27  ;;  %v620_v58 = vmul.f32 %v2263_v31, %v2215_v13  ;;  %v517_v59 = vmul.f32 %v2220_v15, %v2332_v56  ;;  %s1784_s24 = sld [smem:[#allocation4 + $0x17]] }
  0x31   : > { %v750_v53 = vmul.f32 %v2320_v52, %v2218_v14  ;;  %v2345_v61 = vstv %s1780_s28  ;;  %v660_v62 = vmul.f32 %v2284_v39, %v2244_v24  ;;  %v725_v1 = vmul.f32 %v2309_v48, %v2249_v26  ;;  %s1766_s22 = sld [smem:[#allocation4 + $0x6]] }
  0x32   : > { %v801_v63 = vmul.f32 %v2345_v61, %v2191_v2  ;;  %v2359_v5 = vstv %s1781_s29  ;;  %v595_v6 = vmul.f32 %v2246_v25, %v2357_v3  ;;  %v751_v9 = vmul.f32 %v2320_v52, %v2249_v26  ;;  %s1786_s25 = sld [smem:[#allocation4 + $0x19]] }
  0x33   : > { %v827_v8 = vmul.f32 %v2359_v5, %v2191_v2  ;;  %v802_v11 = vmul.f32 %v2345_v61, %v2188_v0  ;;  %v621_v12 = vmul.f32 %v2263_v31, %v2357_v3  ;;  %v686_v15 = vmul.f32 %v2298_v44, %v2244_v24  ;;  %s1787_s26 = sld [smem:[#allocation4 + $0x1a]] }
  0x34   : > { %s564_s27 = sld [smem:[#allocation7]] }
  0x35   : > { %s1769_s28 = sld [smem:[#allocation4 + $0x9]] }
  0x36   : > { %s1772_s29 = sld [smem:[#allocation4 + $0xc]] }
  0x37   : > { %394 = vrot.lane.b32.xlu2 %v384_v17, %s2050_s15 }
  0x38   : > { %522 = vrot.lane.b32.xlu1 %v514_v18, %s2050_s15  ;;  %458 = vrot.lane.b32.xlu0 %v449_v19, %s2050_s15  ;;  %v2383_v18 = vstv %s1783_s17  ;;  %v2385_v19 = vstv %s370_s18  ;;  %s1775_s17 = sld [smem:[#allocation4 + $0xf]] }
  0x39   : > { %v867_v25 = vmul.f32 %v2383_v18, %v2200_v7  ;;  %s1789_s18 = sld [smem:[#allocation9 + $0x1]] }
  0x3f   : > { %420 = vrot.lane.b32.xlu2 %v410_v21, %s2049_s10 }
  0x40   : > { %548 = vrot.lane.b32.xlu1 %v540_v22, %s2049_s10  ;;  %484 = vrot.lane.b32.xlu0 %v475_v23, %s2049_s10  ;;  %v828_v22 = vmul.f32 %v2359_v5, %v2188_v0  ;;  %v726_v23 = vmul.f32 %v2309_v48, %v2282_v38 }
  0x47   : > { %460 = vrot.lane.b32.xlu2 %v450_v27, %s2050_s15  ;;  %v376_v27 = vmul.f32 %v2385_v19, %v2191_v2 }
  0x48   : > { %600 = vrot.lane.b32.xlu1 %v592_v28, %s2050_s15  ;;  %524 = vrot.lane.b32.xlu0 %v515_v29, %s2050_s15  ;;  %v2398_v28 = vstv %s1763_s23  ;;  %s1778_s23 = sld [smem:[#allocation7 + $0x1]] }
  0x4f   : > { %396 = vrot.lane.b32.xlu2 %v385_v32, %s2050_s15  ;;  %v438_v32 = vmul.f32 %v2398_v28, %v2200_v7 }
  0x50   : > { %626 = vrot.lane.b32.xlu1 %v618_v33, %s2049_s10  ;;  %550 = vrot.lane.b32.xlu0 %v541_v34, %s2049_s10  ;;  %v2405_v33 = vld [vmem:[%s2185_s30 + $0x19] sm:$0x3]  ;;  %v2407_v34 = vstv %s1784_s24  ;;  %s1792_s24 = sld [smem:[#allocation9 + $0x4]] }
  0x57   : > { %602 = vrot.lane.b32.xlu2 %v593_v35, %s2050_s15 }
  0x58   : > { %422 = vrot.lane.b32.xlu1 %v411_v36, %s2049_s10  ;;  %486 = vrot.lane.b32.xlu0 %v476_v37, %s2049_s10 }
  0x5f   : > { %628 = vrot.lane.b32.xlu2 %v619_v40, %s2049_s10  ;;  %v752_v40 = vmul.f32 %v2320_v52, %v2282_v38 }
  0x60   : > { %526 = vrot.lane.b32.xlu1 %v516_v41, %s2050_s15  ;;  %666 = vrot.lane.b32.xlu0 %v658_v42, %s2050_s15  ;;  %v661_v41 = vmul.f32 %v2284_v39, %v2405_v33  ;;  %v893_v42 = vmul.f32 %v2407_v34, %v2200_v7 }
  0x67   : > { %552 = vrot.lane.b32.xlu2 %v542_v45, %s2049_s10 }
  0x68   : > { %462 = vrot.lane.b32.xlu1 %v451_v46, %s2050_s15  ;;  %692 = vrot.lane.b32.xlu0 %v684_v47, %s2049_s10  ;;  %v2415_v46 = vstv %s1766_s22  ;;  %s1793_s22 = sld [smem:[#allocation9 + $0x5]] }
  0x69   : > { %v504_v39 = vmul.f32 %v2415_v46, %v2218_v14 }
  0x6f   : > { %732 = vrot.lane.b32.xlu2 %v724_v49, %s2050_s15  ;;  %v2420_v49 = vstv %s1786_s25  ;;  %s1796_s25 = sld [smem:[#allocation9 + $0x8]] }
  0x70   : > { %668 = vrot.lane.b32.xlu1 %v659_v50, %s2050_s15  ;;  %488 = vrot.lane.b32.xlu0 %v477_v51, %s2049_s10 }
  0x77   : > { %758 = vrot.lane.b32.xlu2 %v750_v53, %s2049_s10 }
  0x78   : > { %694 = vrot.lane.b32.xlu1 %v685_v54, %s2049_s10  ;;  %604 = vrot.lane.b32.xlu0 %v594_v55, %s2050_s15  ;;  %v377_v55 = vmul.f32 %v2385_v19, %v2188_v0 }
  0x7f   : > { %554 = vrot.lane.b32.xlu2 %v543_v57, %s2049_s10  ;;  %v933_v57 = vmul.f32 %v2420_v49, %v2218_v14 }
  0x80   : > { %630 = vrot.lane.b32.xlu1 %v620_v58, %s2049_s10  ;;  %528 = vrot.lane.b32.xlu0 %v517_v59, %s2050_s15  ;;  %v868_v58 = vmul.f32 %v2383_v18, %v2223_v16  ;;  %v687_v59 = vmul.f32 %v2298_v44, %v2405_v33 }
  0x81   : > { %v2343_v60 = vpop.permute.xlu2 %418 }
  0x87   : > { %670 = vrot.lane.b32.xlu2 %v660_v62, %s2050_s15 }
  0x88   : > { %809 = vrot.lane.b32.xlu1 %v801_v63, %s2050_s15  ;;  %734 = vrot.lane.b32.xlu0 %v725_v1, %s2050_s15  ;;  %v2437_v1 = vstv %s1787_s26  ;;  %s1795_s26 = sld [smem:[#allocation9 + $0x7]] }
  0x89   : > { %v483_v4 = vpop.permute.xlu2 %482 }
  0x8f   : > { %606 = vrot.lane.b32.xlu2 %v595_v6, %s2050_s15 }
  0x90   : > { %835 = vrot.lane.b32.xlu1 %v827_v8, %s2049_s10  ;;  %760 = vrot.lane.b32.xlu0 %v751_v9, %s2049_s10  ;;  %v2441_v8 = vstv %s564_s27  ;;  %s1799_s27 = sld [smem:[#allocation9 + $0xb]] }
  0x91   : > { %v2370_v10 = vpop.permute.xlu2 %394 }
  0x97   : > { %811 = vrot.lane.b32.xlu2 %v802_v11, %s2050_s15 }
  0x98   : > { %632 = vrot.lane.b32.xlu1 %v621_v12, %s2049_s10  ;;  %696 = vrot.lane.b32.xlu0 %v686_v15, %s2049_s10  ;;  %v439_v12 = vmul.f32 %v2398_v28, %v2223_v16 }
  0x99   : > { %v2381_v17 = vpop.permute.xlu2 %420 }
  0x9a   : > { %v393_v20 = vpop.permute.xlu1 %392  ;;  %v391_v21 = vpop.permute.xlu0 %390 }
  0x9b   : > { %v402_v29 = vadd.f32 %v391_v21, %v376_v27  ;;  %v403_v63 = vadd.f32 %v393_v20, %v377_v55  ;;  %v959_v20 = vmul.f32 %v2437_v1, %v2218_v14  ;;  %v894_v21 = vmul.f32 %v2407_v34, %v2223_v16 }
  0x9d   : > { %v429_v44 = vadd.f32 %v2343_v60, %v403_v63  ;;  %v2457_v60 = vld [vmem:[%s2185_s30 + $0x1a] sm:$0x3]  ;;  %v379_v63 = vmul.f32 %v2385_v19, %v2261_v30 }
  0x9f   : > { %837 = vrot.lane.b32.xlu2 %v828_v22, %s2049_s10  ;;  %v803_v22 = vmul.f32 %v2345_v61, %v2215_v13 }
  0xa0   : > { %736 = vrot.lane.b32.xlu1 %v726_v23, %s2050_s15  ;;  %875 = vrot.lane.b32.xlu0 %v867_v25, %s2050_s15  ;;  %v443_v25 = vadd.f32 %v439_v12, %v429_v44  ;;  %v2494_v44 = vld [vmem:[%s2185_s30 + $0x18] sm:$0x3] }
  0xa1   : > { %v2400_v31 = vpop.permute.xlu2 %460 }
  0xa2   : > { %v457_v35 = vpop.permute.xlu1 %456  ;;  %v417_v36 = vpop.permute.xlu0 %416 }
  0xa3   : > { %v428_v37 = vadd.f32 %v417_v36, %v402_v29 }
  0xa5   : > { %v442_v45 = vadd.f32 %v438_v32, %v428_v37  ;;  %v378_v37 = vmul.f32 %v2385_v19, %v2215_v13  ;;  %v441_v19 = vmul.f32 %v2398_v28, %v2296_v43  ;;  %v506_v43 = vmul.f32 %v2415_v46, %v2282_v38 }
  0xa7   : > { %v468_v47 = vadd.f32 %v457_v35, %v442_v45  ;;  %762 = vrot.lane.b32.xlu2 %v752_v40, %s2049_s10  ;;  %v829_v45 = vmul.f32 %v2359_v5, %v2215_v13 }
  0xa8   : > { %672 = vrot.lane.b32.xlu1 %v661_v41, %s2050_s15  ;;  %901 = vrot.lane.b32.xlu0 %v893_v42, %s2049_s10  ;;  %v505_v41 = vmul.f32 %v2415_v46, %v2249_v26  ;;  %v753_v42 = vmul.f32 %v2320_v52, %v2457_v60 }
  0xa9   : > { %v2422_v50 = vpop.permute.xlu2 %396  ;;  %v494_v51 = vadd.f32 %v483_v4, %v468_v47  ;;  %v727_v47 = vmul.f32 %v2309_v48, %v2457_v60  ;;  %v440_v48 = vmul.f32 %v2398_v28, %v2244_v24 }
  0xaa   : > { %v523_v53 = vpop.permute.xlu1 %522  ;;  %v459_v54 = vpop.permute.xlu0 %458  ;;  %v405_v12 = vadd.f32 %v2422_v50, %v379_v63  ;;  %v895_v50 = vmul.f32 %v2407_v34, %v2244_v24 }
  0xab   : > { %v508_v62 = vadd.f32 %v504_v39, %v494_v51  ;;  %v469_v29 = vadd.f32 %v459_v54, %v443_v25  ;;  %v404_v39 = vadd.f32 %v2370_v10, %v378_v37  ;;  %v960_v10 = vmul.f32 %v2437_v1, %v2249_v26 }
  0xac   : > { %v830_v25 = vmul.f32 %v2359_v5, %v2494_v44  ;;  %v2514_v5 = vstv %s1772_s29  ;;  %s1779_s29 = sld [smem:[#allocation4 + $0x12]] }
  0xad   : > { %v534_v4 = vadd.f32 %v523_v53, %v508_v62  ;;  %v934_v62 = vmul.f32 %v2420_v49, %v2249_v26 }
  0xaf   : > { %941 = vrot.lane.b32.xlu2 %v933_v57, %s2050_s15  ;;  %v430_v57 = vadd.f32 %v2381_v17, %v404_v39 }
  0xb0   : > { %877 = vrot.lane.b32.xlu1 %v868_v58, %s2050_s15  ;;  %698 = vrot.lane.b32.xlu0 %v687_v59, %s2049_s10  ;;  %v869_v59 = vmul.f32 %v2383_v18, %v2244_v24 }
  0xb1   : > { %v2439_v6 = vpop.permute.xlu2 %602 }
  0xb2   : > { %v549_v9 = vpop.permute.xlu1 %548  ;;  %v485_v11 = vpop.permute.xlu0 %484 }
  0xb3   : > { %v560_v15 = vadd.f32 %v549_v9, %v534_v4  ;;  %v495_v40 = vadd.f32 %v485_v11, %v469_v29  ;;  %v444_v9 = vadd.f32 %v440_v48, %v430_v57  ;;  %v2489_v11 = vstv %s1769_s28  ;;  %v2534_v48 = vld [vmem:[%s2185_s30 + $0x1a] sm:$0x3]  ;;  %s1798_s28 = sld [smem:[#allocation9 + $0xa]] }
  0xb5   : > { %v566_v23 = vadd.f32 %v2441_v8, %v560_v15  ;;  %v509_v51 = vadd.f32 %v505_v41, %v495_v40  ;;  %v2517_v40 = vld [vmem:[%s2185_s30 + $0x19] sm:$0x3]  ;;  %s1790_s30 = sld [smem:[#allocation9 + $0x2]] }
  0xb6   : > { %v870_v39 = vmul.f32 %v2383_v18, %v2517_v40 }
  0xb7   : > { %v570_v27 = vmax.f32 %v566_v23, 0.0  ;;  %967 = vrot.lane.b32.xlu2 %v959_v20, %s2049_s10 }
  0xb8   : > { %903 = vrot.lane.b32.xlu1 %v894_v21, %s2049_s10  ;;  %813 = vrot.lane.b32.xlu0 %v803_v22, %s2050_s15  ;;  %v470_v21 = vadd.f32 %v2400_v31, %v444_v9  ;;  %v586_v22 = vmul.f32 %v2489_v11, %v2191_v2 }
  0xb9   : > { %575 = vst.msk [vmem:[#allocation2] sm:$0xff] %vm574_vm0, %v570_v27  ;;  %v2460_v32 = vpop.permute.xlu2 %628  ;;  %v804_v27 = vmul.f32 %v2345_v61, %v2494_v44 }
  0xba   : > { %v601_v35 = vpop.permute.xlu1 %600  ;;  %v525_v36 = vpop.permute.xlu0 %524 }
  0xbb   : > { %v535_v53 = vadd.f32 %v525_v36, %v509_v51  ;;  %v612_v31 = vadd.f32 %v601_v35, %v586_v22  ;;  %v648_v35 = vmul.f32 %v2514_v5, %v2200_v7  ;;  %v935_v51 = vmul.f32 %v2420_v49, %v2282_v38 }
  0xbf   : > { %764 = vrot.lane.b32.xlu2 %v753_v42, %s2049_s10 }
  0xc0   : > { %839 = vrot.lane.b32.xlu1 %v829_v45, %s2049_s10  ;;  %738 = vrot.lane.b32.xlu0 %v727_v47, %s2050_s15  ;;  %v961_v47 = vmul.f32 %v2437_v1, %v2282_v38  ;;  %v2543_v9 = vld [vmem:[#allocation2] sm:$0xff] }
  0xc1   : > { %v553_v54 = vpop.permute.xlu2 %552 }
  0xc2   : > { %v627_v55 = vpop.permute.xlu1 %626  ;;  %v551_v52 = vpop.permute.xlu0 %550 }
  0xc3   : > { %v561_v58 = vadd.f32 %v551_v52, %v535_v53  ;;  %v638_v42 = vadd.f32 %v627_v55, %v612_v31  ;;  %v2527_v52 = vstv %s1775_s17  ;;  %s1782_s17 = sld [smem:[#allocation4 + $0x15]] }
  0xc5   : > { %v567_v4 = vadd.f32 %v2441_v8, %v561_v58  ;;  %v652_v55 = vadd.f32 %v648_v35, %v638_v42  ;;  %v2580_v35 = vstv %s1793_s22  ;;  %s1805_s22 = sld [smem:[#allocation9 + $0x11]] }
  0xc7   : > { %v571_v17 = vmax.f32 %v567_v4, 0.0  ;;  %969 = vrot.lane.b32.xlu2 %v960_v10, %s2049_s10  ;;  %v936_v4 = vmul.f32 %v2420_v49, %v2534_v48 }
  0xc8   : > { %879 = vrot.lane.b32.xlu1 %v869_v59, %s2050_s15  ;;  %943 = vrot.lane.b32.xlu0 %v934_v62, %s2050_s15 }
  0xc9   : > { %576 = vst.msk [vmem:[#allocation2 + $0x8] sm:$0xff] %vm574_vm0, %v571_v17  ;;  %v733_v30 = vpop.permute.xlu2 %732  ;;  %v2545_v17 = vstv %s1789_s18  ;;  %s1802_s18 = sld [smem:[#allocation9 + $0xe]] }
  0xca   : > { %v423_v15 = vpop.permute.xlu1 %422  ;;  %v487_v20 = vpop.permute.xlu0 %486 }
  0xcb   : > { %v431_v23 = vadd.f32 %v423_v15, %v405_v12  ;;  %v496_v29 = vadd.f32 %v487_v20, %v470_v21  ;;  %v896_v12 = vmul.f32 %v2407_v34, %v2517_v40  ;;  %v1008_v15 = vmul.f32 %v2545_v17, %v2543_v9 }
  0xcd   : > { %v445_v28 = vadd.f32 %v441_v19, %v431_v23  ;;  %v510_v37 = vadd.f32 %v506_v43, %v496_v29  ;;  %v507_v23 = vmul.f32 %v2415_v46, %v2332_v56  ;;  %v1027_v43 = vstv %s1790_s30  ;;  %s1788_s30 = sld [smem:[#allocation7 + $0x2]] }
  0xce   : > { %v1028_v46 = vmul.f32 %v1027_v43, %v2543_v9 }
  0xcf   : > { %841 = vrot.lane.b32.xlu2 %v830_v25, %s2049_s10  ;;  %v2558_v25 = vstv %s1778_s23  ;;  %s1801_s23 = sld [smem:[#allocation9 + $0xd]] }
  0xd0   : > { %905 = vrot.lane.b32.xlu1 %v895_v50, %s2049_s10  ;;  %815 = vrot.lane.b32.xlu0 %v804_v27, %s2050_s15  ;;  %v2560_v27 = vld [vmem:[#allocation2 + $0x1] sm:$0xff] }
  0xd1   : > { %v759_v36 = vpop.permute.xlu2 %758  ;;  %v2576_v42 = vld [vmem:[#allocation2 + $0x8] sm:$0xff] }
  0xd2   : > { %v527_v61 = vpop.permute.xlu1 %526  ;;  %v667_v41 = vpop.permute.xlu0 %666 }
  0xd3   : > { %v536_v45 = vadd.f32 %v527_v61, %v510_v37  ;;  %v678_v10 = vadd.f32 %v667_v41, %v652_v55 }
  0xd5   : > { %v562_v53 = vadd.f32 %v553_v54, %v536_v45  ;;  %v714_v54 = vmul.f32 %v2527_v52, %v2218_v14  ;;  %v587_v45 = vmul.f32 %v2489_v11, %v2188_v0 }
  0xd7   : > { %v568_v57 = vadd.f32 %v2441_v8, %v562_v53  ;;  %971 = vrot.lane.b32.xlu2 %v961_v47, %s2049_s10  ;;  %v1029_v47 = vmul.f32 %v1027_v43, %v2576_v42  ;;  %v613_v53 = vadd.f32 %v2439_v6, %v587_v45 }
  0xd8   : > { %881 = vrot.lane.b32.xlu1 %v870_v39, %s2050_s15  ;;  %945 = vrot.lane.b32.xlu0 %v935_v51, %s2050_s15  ;;  %v1009_v39 = vmul.f32 %v2545_v17, %v2576_v42  ;;  %v1079_v51 = vmul.f32 %v2580_v35, %v2560_v27 }
  0xd9   : > { %v572_v58 = vmax.f32 %v568_v57, 0.0  ;;  %v2536_v18 = vpop.permute.xlu2 %554 }
  0xda   : > { %v463_v59 = vpop.permute.xlu1 %462  ;;  %v693_v62 = vpop.permute.xlu0 %692 }
  0xdb   : > { %577 = vst.msk [vmem:[#allocation2 + $0x10] sm:$0xff] %vm574_vm0, %v572_v58  ;;  %v704_v63 = vadd.f32 %v693_v62, %v678_v10  ;;  %v471_v49 = vadd.f32 %v463_v59, %v445_v28  ;;  %v962_v28 = vmul.f32 %v2437_v1, %v2534_v48  ;;  %v2593_v10 = vld [vmem:[#allocation2 + $0x2] sm:$0xff]  ;;  %v639_v59 = vadd.f32 %v2460_v32, %v613_v53 }
  0xdc   : > { %v649_v62 = vmul.f32 %v2514_v5, %v2223_v16  ;;  %v2634_v53 = vstv %s1799_s27  ;;  %s1807_s27 = sld [smem:[#allocation9 + $0x13]] }
  0xdd   : > { %v718_v19 = vadd.f32 %v714_v54, %v704_v63  ;;  %v2595_v54 = vstv %s1796_s25  ;;  %v2600_v63 = vstv %s1795_s26  ;;  %s1804_s25 = sld [smem:[#allocation9 + $0x10]] }
  0xde   : > { %v653_v32 = vadd.f32 %v649_v62, %v639_v59  ;;  %v2638_v62 = vstv %s1798_s28  ;;  %s1808_s26 = sld [smem:[#allocation9 + $0x14]] }
  0xdf   : > { %v744_v20 = vadd.f32 %v733_v30, %v718_v19  ;;  %947 = vrot.lane.b32.xlu2 %v936_v4, %s2050_s15  ;;  %v2562_v30 = vstv %s1792_s24  ;;  %v1130_v19 = vmul.f32 %v2595_v54, %v2593_v10  ;;  %s1785_s24 = sld [smem:[#allocation4 + $0x18]] }
  0xe0   : > { %907 = vrot.lane.b32.xlu0 %v896_v12, %s2049_s10  ;;  %1014 = vrot.lane.b32.xlu1 %v1008_v15, %s2050_s15  ;;  %v1110_v15 = vmul.f32 %v2600_v63, %v2593_v10  ;;  %s1811_s28 = sld [smem:[#allocation9 + $0x17]] }
  0xe1   : > { %v770_v21 = vadd.f32 %v759_v36, %v744_v20  ;;  %v2554_v22 = vpop.permute.xlu2 %670  ;;  %v1059_v36 = vmul.f32 %v2562_v30, %v2560_v27 }
  0xe2   : > { %v669_v34 = vpop.permute.xlu1 %668  ;;  %v489_v50 = vpop.permute.xlu0 %488  ;;  %v2602_v4 = vld [vmem:[#allocation2 + $0x9] sm:$0xff] }
  0xe3   : > { %v497_v29 = vadd.f32 %v489_v50, %v471_v49  ;;  %v776_v31 = vadd.f32 %v2558_v25, %v770_v21  ;;  %v1060_v20 = vmul.f32 %v2562_v30, %v2602_v4 }
  0xe5   : > { %v511_v56 = vadd.f32 %v507_v23, %v497_v29  ;;  %v780_v37 = vmax.f32 %v776_v31, 0.0 }
  0xe7   : > { %1065 = vrot.lane.b32.xlu2 %v1059_v36, %s2050_s15  ;;  %785 = vst.msk [vmem:[#allocation2 + $0x20] sm:$0xff] %vm574_vm0, %v780_v37  ;;  %v588_v36 = vmul.f32 %v2489_v11, %v2215_v13 }
  0xe8   : > { %1034 = vrot.lane.b32.xlu0 %v1028_v46, %s2049_s10  ;;  %973 = vrot.lane.b32.xlu1 %v962_v28, %s2049_s10  ;;  %v2617_v28 = vld [vmem:[#allocation2 + $0x10] sm:$0xff]  ;;  %v1080_v46 = vmul.f32 %v2580_v35, %v2602_v4 }
  0xe9   : > { %v2574_v61 = vpop.permute.xlu2 %606 }
  0xea   : > { %v695_v1 = vpop.permute.xlu1 %694  ;;  %v605_v41 = vpop.permute.xlu0 %604 }
  0xef   : > { %1036 = vrot.lane.b32.xlu2 %v1029_v47, %s2049_s10 }
  0xf0   : > { %1016 = vrot.lane.b32.xlu0 %v1009_v39, %s2050_s15  ;;  %1085 = vrot.lane.b32.xlu1 %v1079_v51, %s2049_s10 }
  0xf1   : > { %v2591_v57 = vpop.permute.xlu2 %811 }
  0xf2   : > { %v631_v55 = vpop.permute.xlu1 %630  ;;  %v529_v58 = vpop.permute.xlu0 %528 }
  0xf3   : > { %v537_v6 = vadd.f32 %v529_v58, %v511_v56  ;;  %v1010_v56 = vmul.f32 %v2545_v17, %v2617_v28  ;;  %v650_v17 = vmul.f32 %v2514_v5, %v2244_v24 }
  0xf5   : > { %v563_v12 = vadd.f32 %v2536_v18, %v537_v6  ;;  %v679_v18 = vadd.f32 %v669_v34, %v653_v32  ;;  %v1030_v34 = vmul.f32 %v1027_v43, %v2617_v28  ;;  %v2632_v43 = vld [vmem:[#allocation2 + $0x20] sm:$0xff]  ;;  %v2640_v6 = vld [vmem:[#allocation2 + $0xa] sm:$0xff] }
  0xf7   : > { %v569_v49 = vadd.f32 %v2441_v8, %v563_v12  ;;  %1136 = vrot.lane.b32.xlu2 %v1130_v19, %s2049_s10  ;;  %v705_v31 = vadd.f32 %v695_v1, %v679_v18  ;;  %v715_v8 = vmul.f32 %v2527_v52, %v2249_v26  ;;  %v614_v1 = vadd.f32 %v605_v41, %v588_v36 }
  0xf8   : > { %1116 = vrot.lane.b32.xlu0 %v1110_v15, %s2050_s15  ;;  %1067 = vrot.lane.b32.xlu1 %v1060_v20, %s2050_s15  ;;  %v1181_v41 = vmul.f32 %v2634_v53, %v2632_v43  ;;  %v1161_v19 = vmul.f32 %v2638_v62, %v2632_v43  ;;  %v1111_v15 = vmul.f32 %v2600_v63, %v2640_v6 }
  0xf9   : > { %v573_v21 = vmax.f32 %v569_v49, 0.0  ;;  %v2615_v23 = vpop.permute.xlu2 %837  ;;  %v719_v37 = vadd.f32 %v715_v8, %v705_v31  ;;  %v640_v58 = vadd.f32 %v631_v55, %v614_v1  ;;  %v2650_v55 = vstv %s1779_s29  ;;  %s1810_s29 = sld [smem:[#allocation9 + $0x16]] }
  0xfa   : > { %v810_v50 = vpop.permute.xlu1 %809  ;;  %v735_v29 = vpop.permute.xlu0 %734  ;;  %v795_v31 = vmul.f32 %v2650_v55, %v2191_v2  ;;  %v2673_v2 = vstv %s1782_s17  ;;  %s998_s17 = sld [smem:[#allocation9]] }
  0xfb   : > { %579 = vst.msk [vmem:[#allocation2 + $0x18] sm:$0x3] %vm578_vm1, %v573_v21  ;;  %v745_v45 = vadd.f32 %v735_v29, %v719_v37  ;;  %v654_v20 = vadd.f32 %v650_v17, %v640_v58  ;;  %v1131_v37 = vmul.f32 %v2595_v54, %v2640_v6 }
  0xfc   : > { %v821_v1 = vadd.f32 %v810_v50, %v795_v31  ;;  %v857_v50 = vmul.f32 %v2673_v2, %v2200_v7 }
  0xfd   : > { %v680_v8 = vadd.f32 %v2554_v22, %v654_v20 }
  0xff   : > { %1038 = vrot.lane.b32.xlu2 %v1030_v34, %s2049_s10 }
 0x100   : > { %1018 = vrot.lane.b32.xlu0 %v1010_v56, %s2050_s15  ;;  %1087 = vrot.lane.b32.xlu1 %v1080_v46, %s2049_s10  ;;  %v716_v56 = vmul.f32 %v2527_v52, %v2282_v38 }
 0x101   : > { %v763_v47 = vpop.permute.xlu2 %762 }
 0x102   : > { %v836_v39 = vpop.permute.xlu1 %835  ;;  %v761_v51 = vpop.permute.xlu0 %760  ;;  %v2657_v29 = vld [vmem:[#allocation2 + $0x11] sm:$0xff] }
 0x103   : > { %v771_v59 = vadd.f32 %v761_v51, %v745_v45  ;;  %v1081_v34 = vmul.f32 %v2580_v35, %v2657_v29  ;;  %v1061_v46 = vmul.f32 %v2562_v30, %v2657_v29  ;;  %v2677_v30 = vstv %s1802_s18  ;;  %s1791_s18 = sld [smem:[#allocation9 + $0x3]] }
 0x104   : > { %v847_v58 = vadd.f32 %v836_v39, %v821_v1 }
 0x105   : > { %v777_v12 = vadd.f32 %v2558_v25, %v771_v59 }
 0x106   : > { %v861_v31 = vadd.f32 %v857_v50, %v847_v58 }
 0x107   : > { %v781_v32 = vmax.f32 %v777_v12, 0.0  ;;  %1187 = vrot.lane.b32.xlu2 %v1181_v41, %s2049_s10  ;;  %v2681_v12 = vstv %s1801_s23  ;;  %s1814_s23 = sld [smem:[#allocation9 + $0x1a]] }
 0x108   : > { %1167 = vrot.lane.b32.xlu0 %v1161_v19, %s2050_s15  ;;  %1118 = vrot.lane.b32.xlu1 %v1111_v15, %s2050_s15 }
 0x109   : > { %786 = vst.msk [vmem:[#allocation2 + $0x28] sm:$0xff] %vm574_vm0, %v781_v32  ;;  %v942_v49 = vpop.permute.xlu2 %941 }
 0x10a   : > { %v2655_v18 = vpop.permute.xlu1 %632  ;;  %v697_v21 = vpop.permute.xlu0 %696 }
 0x10b   : > { %v706_v36 = vadd.f32 %v697_v21, %v680_v8  ;;  %v2691_v21 = vstv %s1785_s24  ;;  %s1813_s24 = sld [smem:[#allocation9 + $0x19]] }
 0x10d   : > { %v720_v35 = vadd.f32 %v716_v56, %v706_v36  ;;  %v923_v36 = vmul.f32 %v2691_v21, %v2218_v14  ;;  %v589_v14 = vmul.f32 %v2489_v11, %v2357_v3 }
 0x10f   : > { %1089 = vrot.lane.b32.xlu2 %v1081_v34, %s2049_s10  ;;  %v615_v3 = vadd.f32 %v2574_v61, %v589_v14 }
 0x110   : > { %1069 = vrot.lane.b32.xlu0 %v1061_v46, %s2050_s15  ;;  %1138 = vrot.lane.b32.xlu1 %v1131_v37, %s2049_s10  ;;  %v2675_v17 = vld [vmem:[#allocation2 + $0x21] sm:$0xff]  ;;  %v2701_v46 = vld [vmem:[#allocation2 + $0x12] sm:$0xff] }
 0x111   : > { %v968_v22 = vpop.permute.xlu2 %967  ;;  %v2683_v41 = vld [vmem:[#allocation2 + $0x28] sm:$0xff]  ;;  %v1232_v15 = vmul.f32 %v2677_v30, %v2675_v17  ;;  %v1212_v20 = vmul.f32 %v2681_v12, %v2675_v17 }
 0x112   : > { %v737_v45 = vpop.permute.xlu1 %736  ;;  %v876_v51 = vpop.permute.xlu0 %875  ;;  %v1162_v32 = vmul.f32 %v2638_v62, %v2683_v41 }
 0x113   : > { %v746_v59 = vadd.f32 %v737_v45, %v720_v35  ;;  %v1132_v35 = vmul.f32 %v2595_v54, %v2701_v46  ;;  %v1112_v45 = vmul.f32 %v2600_v63, %v2701_v46 }
 0x115   : > { %v772_v19 = vadd.f32 %v763_v47, %v746_v59  ;;  %v887_v47 = vadd.f32 %v876_v51, %v861_v31  ;;  %v1182_v51 = vmul.f32 %v2634_v53, %v2683_v41  ;;  %v2713_v59 = vstv %s1788_s30  ;;  %s1794_s30 = sld [smem:[#allocation9 + $0x6]] }
 0x116   : > { %v651_v31 = vmul.f32 %v2514_v5, %v2405_v33 }
 0x117   : > { %v778_v39 = vadd.f32 %v2558_v25, %v772_v19  ;;  %1238 = vrot.lane.b32.xlu2 %v1232_v15, %s2049_s10  ;;  %v2719_v15 = vld [vmem:[#allocation2 + $0x22] sm:$0xff] }
 0x118   : > { %1218 = vrot.lane.b32.xlu0 %v1212_v20, %s2050_s15  ;;  %1169 = vrot.lane.b32.xlu1 %v1162_v32, %s2050_s15  ;;  %v2721_v20 = vstv %s1805_s22  ;;  %s1797_s22 = sld [smem:[#allocation9 + $0x9]] }
 0x119   : > { %v782_v7 = vmax.f32 %v778_v39, 0.0  ;;  %v2697_v8 = vpop.permute.xlu2 %764  ;;  %v796_v39 = vmul.f32 %v2650_v55, %v2188_v0 }
 0x11a   : > { %v673_v34 = vpop.permute.xlu1 %672  ;;  %v902_v56 = vpop.permute.xlu0 %901 }
 0x11b   : > { %787 = vst.msk [vmem:[#allocation2 + $0x30] sm:$0xff] %vm574_vm0, %v782_v7  ;;  %v913_v37 = vadd.f32 %v902_v56, %v887_v47  ;;  %v1283_v47 = vmul.f32 %v2721_v20, %v2719_v15  ;;  %v822_v0 = vadd.f32 %v2591_v57, %v796_v39  ;;  %v717_v57 = vmul.f32 %v2527_v52, %v2457_v60 }
 0x11c   : > { %v2767_v60 = vstv %s1808_s26  ;;  %s1809_s26 = sld [smem:[#allocation9 + $0x15]] }
 0x11d   : > { %v927_v1 = vadd.f32 %v923_v36, %v913_v37 }
 0x11f   : > { %v953_v58 = vadd.f32 %v942_v49, %v927_v1  ;;  %1140 = vrot.lane.b32.xlu2 %v1132_v35, %s2049_s10  ;;  %v2725_v49 = vstv %s1804_s25  ;;  %v858_v35 = vmul.f32 %v2673_v2, %v2223_v16  ;;  %s1800_s25 = sld [smem:[#allocation9 + $0xc]] }
 0x120   : > { %1120 = vrot.lane.b32.xlu0 %v1112_v45, %s2050_s15  ;;  %1189 = vrot.lane.b32.xlu1 %v1182_v51, %s2049_s10  ;;  %v1263_v61 = vmul.f32 %v2725_v49, %v2719_v15  ;;  %v848_v45 = vadd.f32 %v2615_v23, %v822_v0 }
 0x121   : > { %v979_v50 = vadd.f32 %v968_v22, %v953_v58  ;;  %v2717_v54 = vpop.permute.xlu2 %969  ;;  %v641_v22 = vadd.f32 %v2655_v18, %v615_v3 }
 0x122   : > { %v878_v19 = vpop.permute.xlu1 %877  ;;  %v699_v63 = vpop.permute.xlu0 %698  ;;  %v2727_v32 = vld [vmem:[#allocation2 + $0x29] sm:$0xff]  ;;  %v862_v16 = vadd.f32 %v858_v35, %v848_v45 }
 0x123   : > { %v985_v11 = vadd.f32 %v2713_v59, %v979_v50  ;;  %v1213_v36 = vmul.f32 %v2681_v12, %v2727_v32  ;;  %v655_v33 = vadd.f32 %v651_v31, %v641_v22  ;;  %v2747_v37 = vld [vmem:[#allocation2 + $0x30] sm:$0xff]  ;;  %v1233_v50 = vmul.f32 %v2677_v30, %v2727_v32 }
 0x124   : > { %v1183_v14 = vmul.f32 %v2634_v53, %v2747_v37  ;;  %v1163_v58 = vmul.f32 %v2638_v62, %v2747_v37  ;;  %v888_v52 = vadd.f32 %v878_v19, %v862_v16  ;;  %v2771_v39 = vld [vmem:[#allocation2 + $0x2a] sm:$0xff] }
 0x125   : > { %v989_v7 = vmax.f32 %v985_v11, 0.0  ;;  %v681_v1 = vadd.f32 %v673_v34, %v655_v33  ;;  %v2769_v11 = vstv %s1807_s27  ;;  %v1264_v19 = vmul.f32 %v2725_v49, %v2771_v39  ;;  %s1454_s27 = sld [smem:[#allocation3]] }
 0x127   : > { %994 = vst.msk [vmem:[#allocation2 + $0x40] sm:$0xff] %vm574_vm0, %v989_v7  ;;  %1289 = vrot.lane.b32.xlu2 %v1283_v47, %s2049_s10  ;;  %v707_v51 = vadd.f32 %v699_v63, %v681_v1  ;;  %v924_v47 = vmul.f32 %v2691_v21, %v2249_v26 }
 0x128   : > { %1269 = vrot.lane.b32.xlu0 %v1263_v61, %s2050_s15  ;;  %1220 = vrot.lane.b32.xlu1 %v1213_v36, %s2050_s15  ;;  %v797_v36 = vmul.f32 %v2650_v55, %v2215_v13  ;;  %v859_v13 = vmul.f32 %v2673_v2, %v2244_v24 }
 0x129   : > { %v2745_v5 = vpop.permute.xlu2 %841  ;;  %v721_v34 = vadd.f32 %v717_v57, %v707_v51 }
 0x12a   : > { %v904_v18 = vpop.permute.xlu1 %903  ;;  %v814_v56 = vpop.permute.xlu0 %813 }
 0x12b   : > { %v914_v22 = vadd.f32 %v904_v18, %v888_v52  ;;  %v823_v35 = vadd.f32 %v814_v56, %v797_v36 }
 0x12d   : > { %v928_v26 = vadd.f32 %v924_v47, %v914_v22 }
 0x12e   : > { %v2765_v3 = vld [vmem:[#allocation2 + $0x40] sm:$0xff] }
 0x12f   : > { %1191 = vrot.lane.b32.xlu2 %v1183_v14, %s2049_s10  ;;  %v1334_v7 = vmul.f32 %v2767_v60, %v2765_v3  ;;  %v1314_v61 = vmul.f32 %v2769_v11, %v2765_v3  ;;  %v1284_v14 = vmul.f32 %v2721_v20, %v2771_v39 }
 0x130   : > { %1171 = vrot.lane.b32.xlu0 %v1163_v58, %s2050_s15  ;;  %1240 = vrot.lane.b32.xlu1 %v1233_v50, %s2049_s10  ;;  %v798_v50 = vmul.f32 %v2650_v55, %v2494_v44  ;;  %v925_v44 = vmul.f32 %v2691_v21, %v2282_v38  ;;  %v2813_v55 = vstv %s1811_s28 }
 0x131   : > { %v2763_v23 = vpop.permute.xlu2 %971 }
 0x132   : > { %v840_v53 = vpop.permute.xlu1 %839  ;;  %v739_v63 = vpop.permute.xlu0 %738 }
 0x133   : > { %v747_v62 = vadd.f32 %v739_v63, %v721_v34  ;;  %v849_v51 = vadd.f32 %v840_v53, %v823_v35 }
 0x135   : > { %v773_v31 = vadd.f32 %v2697_v8, %v747_v62  ;;  %v863_v58 = vadd.f32 %v859_v13, %v849_v51 }
 0x137   : > { %v779_v0 = vadd.f32 %v2558_v25, %v773_v31  ;;  %1340 = vrot.lane.b32.xlu2 %v1334_v7, %s2049_s10  ;;  %v2815_v31 = vstv %s1810_s29 }
 0x138   : > { %1320 = vrot.lane.b32.xlu0 %v1314_v61, %s2050_s15  ;;  %1271 = vrot.lane.b32.xlu1 %v1264_v19, %s2050_s15 }
 0x139   : > { %v783_v8 = vmax.f32 %v779_v0, 0.0  ;;  %v2788_v33 = vpop.permute.xlu2 %947 }
 0x13a   : > { %v880_v18 = vpop.permute.xlu1 %879  ;;  %v944_v1 = vpop.permute.xlu0 %943 }
 0x13b   : > { %788 = vst.msk [vmem:[#allocation2 + $0x38] sm:$0x3] %vm578_vm1, %v783_v8  ;;  %v954_v45 = vadd.f32 %v944_v1, %v928_v26  ;;  %v889_v24 = vadd.f32 %v880_v18, %v863_v58  ;;  %v2836_v18 = vstv %s998_s17 }
 0x13c   : > { %v1003_v13 = vmul.f32 %v2836_v18, %v2543_v9  ;;  %v2855_v9 = vstv %s1791_s18 }
 0x13d   : > { %v980_v25 = vadd.f32 %v2717_v54, %v954_v45 }
 0x13f   : > { %v986_v57 = vadd.f32 %v2713_v59, %v980_v25 }
 0x140   : > { %1291 = vrot.lane.b32.xlu1 %v1284_v14, %s2049_s10 }
 0x141   : > { %v990_v56 = vmax.f32 %v986_v57, 0.0  ;;  %v2803_v54 = vpop.permute.xlu2 %1065 }
 0x142   : > { %v906_v16 = vpop.permute.xlu1 %905  ;;  %v816_v34 = vpop.permute.xlu0 %815  ;;  %v2800_v53 = vld [vmem:[#allocation2 + $0x31] sm:$0xff] }
 0x143   : > { %995 = vst.msk [vmem:[#allocation2 + $0x48] sm:$0xff] %vm574_vm0, %v990_v56  ;;  %v1234_v63 = vmul.f32 %v2677_v30, %v2800_v53  ;;  %v1214_v52 = vmul.f32 %v2681_v12, %v2800_v53  ;;  %v915_v62 = vadd.f32 %v906_v16, %v889_v24  ;;  %v824_v22 = vadd.f32 %v816_v34, %v798_v50  ;;  %v2839_v35 = vld [vmem:[#allocation2 + $0x32] sm:$0xff] }
 0x144   : > { %v860_v30 = vmul.f32 %v2673_v2, %v2517_v40  ;;  %v1285_v56 = vmul.f32 %v2721_v20, %v2839_v35  ;;  %v1265_v50 = vmul.f32 %v2725_v49, %v2839_v35  ;;  %v2859_v24 = vstv %s1814_s23 }
 0x145   : > { %1242 = vrot.lane.b32.xlu2 %v1234_v63, %s2049_s10  ;;  %1222 = vrot.lane.b32.xlu0 %v1214_v52, %s2050_s15  ;;  %v850_v7 = vadd.f32 %v2745_v5, %v824_v22  ;;  %v929_v12 = vadd.f32 %v925_v44, %v915_v62  ;;  %v2861_v20 = vstv %s1813_s24  ;;  %v1051_v63 = vmul.f32 %v2855_v9, %v2560_v27 }
 0x147   : > { %v864_v26 = vadd.f32 %v860_v30, %v850_v7 }
 0x149   : > { %v2831_v2 = vpop.permute.xlu2 %1036 }
 0x14a   : > { %v882_v47 = vpop.permute.xlu1 %881  ;;  %v946_v61 = vpop.permute.xlu0 %945  ;;  %v2820_v19 = vld [vmem:[#allocation2 + $0x41] sm:$0xff] }
 0x14b   : > { %v2822_v36 = vld [vmem:[#allocation2 + $0x48] sm:$0xff]  ;;  %v955_v0 = vadd.f32 %v946_v61, %v929_v12  ;;  %v1385_v38 = vmul.f32 %v2813_v55, %v2820_v19  ;;  %v1365_v8 = vmul.f32 %v2815_v31, %v2820_v19  ;;  %v890_v45 = vadd.f32 %v882_v47, %v864_v26 }
 0x14c   : > { %v1315_v5 = vmul.f32 %v2769_v11, %v2822_v36  ;;  %v1335_v16 = vmul.f32 %v2767_v60, %v2822_v36  ;;  %v1004_v26 = vmul.f32 %v2836_v18, %v2576_v42 }
 0x14d   : > { %v981_v40 = vadd.f32 %v2763_v23, %v955_v0  ;;  %1391 = vrot.lane.b32.xlu2 %v1385_v38, %s2049_s10  ;;  %1371 = vrot.lane.b32.xlu0 %v1365_v8, %s2050_s15  ;;  %v926_v23 = vmul.f32 %v2691_v21, %v2534_v48  ;;  %v2857_v21 = vld [vmem:[#allocation2 + $0x42] sm:$0xff]  ;;  %v2879_v38 = vstv %s1794_s30 }
 0x14e   : > { %1322 = vrot.lane.b32.xlu1 %v1315_v5, %s2050_s15  ;;  %v1436_v22 = vmul.f32 %v2859_v24, %v2857_v21  ;;  %v1416_v12 = vmul.f32 %v2861_v20, %v2857_v21 }
 0x14f   : > { %v987_v1 = vadd.f32 %v2713_v59, %v981_v40 }
 0x151   : > { %v991_v51 = vmax.f32 %v987_v1, 0.0  ;;  %v1137_v48 = vpop.permute.xlu2 %1136  ;;  %v1102_v1 = vmul.f32 %v2879_v38, %v2593_v10  ;;  %v1052_v10 = vmul.f32 %v2855_v9, %v2602_v4 }
 0x152   : > { %v908_v25 = vpop.permute.xlu0 %907  ;;  %v1015_v14 = vpop.permute.xlu1 %1014 }
 0x153   : > { %996 = vst.msk [vmem:[#allocation2 + $0x50] sm:$0xff] %vm574_vm0, %v991_v51  ;;  %v916_v57 = vadd.f32 %v908_v25, %v890_v45  ;;  %v1023_v58 = vadd.f32 %v1015_v14, %v1003_v13 }
 0x155   : > { %v930_v34 = vadd.f32 %v926_v23, %v916_v57  ;;  %1293 = vrot.lane.b32.xlu2 %v1285_v56, %s2049_s10  ;;  %1273 = vrot.lane.b32.xlu0 %v1265_v50, %s2050_s15  ;;  %v2904_v56 = vstv %s1797_s22  ;;  %s363_s22 = sand.u32 1, %s2036_s12  }
 0x156   : > { %1342 = vrot.lane.b32.xlu1 %v1335_v16, %s2049_s10  ;;  %s364_s28 = scalar_lea.vmem [#allocation10], %s363_s22  ;;  %s1651_s18 = scalar_lea.sflag [#allocation5], %s363_s22 }
 0x157   : > { %v956_v49 = vadd.f32 %v2788_v33, %v930_v34  ;;  %s1661_s29 = sshll.u32 %s364_s28, 4  ;;  %s1662_s29 = int_to_ptr.vmem [resolvable:$true] %s1661_s29 }
 0x159   : > { %v1039_v5 = vpop.permute.xlu2 %1038 }
 0x15a   : > { %v1035_v52 = vpop.permute.xlu0 %1034  ;;  %v974_v62 = vpop.permute.xlu1 %973  ;;  %v2868_v44 = vld [vmem:[#allocation2 + $0x49] sm:$0xff] }
 0x15b   : > { %v1043_v7 = vadd.f32 %v1035_v52, %v1023_v58  ;;  %v982_v30 = vadd.f32 %v974_v62, %v956_v49  ;;  %v1366_v47 = vmul.f32 %v2815_v31, %v2868_v44  ;;  %v2881_v8 = vld [vmem:[#allocation2 + $0x50] sm:$0xff]  ;;  %v1386_v13 = vmul.f32 %v2813_v55, %v2868_v44 }
 0x15c   : > { %v1316_v23 = vmul.f32 %v2769_v11, %v2881_v8  ;;  %v1153_v52 = vmul.f32 %v2904_v56, %v2632_v43 }
 0x15d   : > { %v1054_v61 = vadd.f32 %v1051_v63, %v1043_v7  ;;  %v988_v33 = vadd.f32 %v2713_v59, %v982_v30  ;;  %1442 = vrot.lane.b32.xlu2 %v1436_v22, %s2049_s10  ;;  %1422 = vrot.lane.b32.xlu0 %v1416_v12, %s2050_s15  ;;  %v1005_v7 = vmul.f32 %v2836_v18, %v2617_v28 }
 0x15e   : > { %1373 = vrot.lane.b32.xlu1 %v1366_v47, %s2050_s15 }
 0x15f   : > { %v992_v27 = vmax.f32 %v988_v33, 0.0  ;;  %v1074_v0 = vadd.f32 %v2803_v54, %v1054_v61  ;;  %v1336_v54 = vmul.f32 %v2767_v60, %v2881_v8  ;;  %v2900_v60 = vld [vmem:[#allocation2 + $0x4a] sm:$0xff] }
 0x160   : > { %v1437_v34 = vmul.f32 %v2859_v24, %v2900_v60  ;;  %v1417_v4 = vmul.f32 %v2861_v20, %v2900_v60 }
 0x161   : > { %997 = vst.msk [vmem:[#allocation2 + $0x58] sm:$0x3] %vm578_vm1, %v992_v27 }
 0x162   : > { %v1017_v59 = vpop.permute.xlu0 %1016  ;;  %v1086_v40 = vpop.permute.xlu1 %1085 }
 0x163   : > { %v1024_v45 = vadd.f32 %v1017_v59, %v1004_v26  ;;  %v1094_v51 = vadd.f32 %v1086_v40, %v1074_v0  ;;  %v1203_v59 = vstv %s1800_s25  ;;  %s1994_s25 = scalar_lea.hbm %s3159_s9, 2 }
 0x165   : > { %v1044_v25 = vadd.f32 %v2831_v2, %v1024_v45  ;;  %1344 = vrot.lane.b32.xlu2 %v1336_v54, %s2049_s10  ;;  %1324 = vrot.lane.b32.xlu0 %v1316_v23, %s2050_s15  ;;  %v1105_v42 = vadd.f32 %v1102_v1, %v1094_v51  ;;  %v1188_v2 = vpop.permute.xlu2 %1187 }
 0x166   : > { %1393 = vrot.lane.b32.xlu1 %v1386_v13, %s2049_s10 }
 0x167   : > { %v1055_v14 = vadd.f32 %v1052_v10, %v1044_v25 }
 0x168   : > { %v2902_v57 = vld [vmem:[#allocation2 + $0x51] sm:$0xff] }
 0x169   : > { %v1367_v49 = vmul.f32 %v2815_v31, %v2902_v57  ;;  %v2917_v22 = vld [vmem:[#allocation2 + $0x52] sm:$0xff]  ;;  %v1103_v31 = vmul.f32 %v2879_v38, %v2640_v6  ;;  %v1387_v43 = vmul.f32 %v2813_v55, %v2902_v57  ;;  %v1053_v6 = vmul.f32 %v2855_v9, %v2657_v29 }
 0x16a   : > { %v1117_v11 = vpop.permute.xlu0 %1116  ;;  %v1068_v58 = vpop.permute.xlu1 %1067  ;;  %v1438_v61 = vmul.f32 %v2859_v24, %v2917_v22  ;;  %v1418_v33 = vmul.f32 %v2861_v20, %v2917_v22  ;;  %v1204_v20 = vmul.f32 %v1203_v59, %v2675_v17  ;;  %v1154_v29 = vmul.f32 %v2904_v56, %v2683_v41 }
 0x16b   : > { %v1125_v50 = vadd.f32 %v1117_v11, %v1105_v42  ;;  %v1075_v16 = vadd.f32 %v1068_v58, %v1055_v14  ;;  %v1104_v42 = vmul.f32 %v2879_v38, %v2701_v46  ;;  %v1205_v46 = vmul.f32 %v1203_v59, %v2727_v32 }
 0x16d   : > { %v1145_v63 = vadd.f32 %v1137_v48, %v1125_v50  ;;  %1444 = vrot.lane.b32.xlu2 %v1437_v34, %s2049_s10  ;;  %1424 = vrot.lane.b32.xlu0 %v1417_v4, %s2050_s15  ;;  %v1090_v27 = vpop.permute.xlu2 %1089 }
 0x16e   : > { %1375 = vrot.lane.b32.xlu1 %v1367_v49, %s2050_s15 }
 0x16f   : > { %v1156_v62 = vadd.f32 %v1153_v52, %v1145_v63 }
 0x172   : > { %v1019_v30 = vpop.permute.xlu0 %1018  ;;  %v1088_v12 = vpop.permute.xlu1 %1087 }
 0x173   : > { %v1025_v48 = vadd.f32 %v1019_v30, %v1005_v7  ;;  %v1095_v47 = vadd.f32 %v1088_v12, %v1075_v16  ;;  %v1155_v30 = vmul.f32 %v2904_v56, %v2747_v37 }
 0x175   : > { %v1045_v0 = vadd.f32 %v1039_v5, %v1025_v48  ;;  %1446 = vrot.lane.b32.xlu2 %v1438_v61, %s2049_s10  ;;  %1395 = vrot.lane.b32.xlu0 %v1387_v43, %s2049_s10  ;;  %v1106_v28 = vadd.f32 %v1103_v31, %v1095_v47  ;;  %v1239_v1 = vpop.permute.xlu2 %1238  ;;  %s1803_s10 = sld [smem:[#allocation9 + $0xf]] }
 0x176   : > { %1426 = vrot.lane.b32.xlu1 %v1418_v33, %s2050_s15  ;;  %s1806_s15 = sld [smem:[#allocation9 + $0x12]] }
 0x177   : > { %v1056_v18 = vadd.f32 %v1053_v6, %v1045_v0 }
 0x17a   : > { %v1168_v24 = vpop.permute.xlu0 %1167  ;;  %v1119_v26 = vpop.permute.xlu1 %1118 }
 0x17b   : > { %v1176_v55 = vadd.f32 %v1168_v24, %v1156_v62  ;;  %v1126_v45 = vadd.f32 %v1119_v26, %v1106_v28  ;;  %v2939_v58 = vstv %s1803_s10  ;;  %v1206_v26 = vmul.f32 %v1203_v59, %v2800_v53  ;;  %v1467_v53 = vld [vmem:[%s3155_s5 + $0x28] sm:$0xff]  ;;  %v1464_v59 = vld [vmem:[%s3155_s5 + $0x10] sm:$0xff] }
 0x17c   : > { %v1255_v16 = vmul.f32 %v2939_v58, %v2719_v15  ;;  %v2946_v47 = vstv %s1806_s15  ;;  %v1256_v37 = vmul.f32 %v2939_v58, %v2771_v39  ;;  %v1466_v39 = vld [vmem:[%s3155_s5 + $0x20] sm:$0xff]  ;;  %1517 = vmatpush.msra.mxu3 %v1467_v53  ;;  %s1659_s15 = scalar_lea.hbm %s3159_s9, %s2125_s4 }
 0x17d   : > { %v1196_v40 = vadd.f32 %v1188_v2, %v1176_v55  ;;  %v1141_v14 = vpop.permute.xlu2 %1140  ;;  %v1306_v33 = vmul.f32 %v2946_v47, %v2765_v3  ;;  %1491 = vmatpush.msra.mxu0 %v1466_v39  ;;  %v1552_v39 = vld [vmem:[%s3157_s7 + $0x50] sm:$0xff]  ;;  %v1566_v53 = vld [vmem:[%s3157_s7 + $0xc0] sm:$0xff]  ;;  %s1663_s17 = sshll.u32 %s1659_s15, 4  ;;  %s1664_s17 = int_to_ptr.hbm [resolvable:$true] %s1663_s17 }
 0x17e   : > { %s1988_s23 = sshra.s32 %s1664_s17, 4  ;;  %s1989_s23 = int_to_ptr.hbm [resolvable:$true] %s1988_s23 }
 0x17f   : > { %v1207_v5 = vadd.f32 %v1204_v20, %v1196_v40  ;;  %1492 = vmatpush.msra.mxu0 %v1464_v59  ;;  %s1990_s24 = scalar_lea.hbm %s1989_s23, 1  ;;  %p1995_p3 = scmp.lt.s32.totalorder %s1989_s23, %s3159_s9 }
 0x180   : > { %p1991_p0 = scmp.ne.s32.totalorder %s1989_s23, %s1990_s24  ;;  %p1996_p4 = scmp.lt.s32.totalorder %s1994_s25, %s1990_s24 }
 0x182   : > { %v1070_v51 = vpop.permute.xlu0 %1069  ;;  %v1139_v54 = vpop.permute.xlu1 %1138  ;;  %p1992_p1 = pnand %p1991_p0, %p2142_p5  ;;  %p1997_p7 = por %p1996_p4, %p1995_p3 }
 0x183   : > { %v1076_v23 = vadd.f32 %v1070_v51, %v1056_v18  ;;  %v1146_v13 = vadd.f32 %v1139_v54, %v1126_v45 }
 0x184   : > { %p1993_p2 = pneg %p1992_p1 }
 0x185   : > { %v1096_v9 = vadd.f32 %v1090_v27, %v1076_v23  ;;  %v1157_v25 = vadd.f32 %v1154_v29, %v1146_v13  ;;  %v1290_v63 = vpop.permute.xlu2 %1289 }
 0x186   : > { %p1998_p8 = pnand %p1997_p7, %p1993_p2 }
 0x187   : > { %v1107_v10 = vadd.f32 %v1104_v42, %v1096_v9  ;;  %v1462_v42 = vld [vmem:[%s3155_s5] sm:$0xff] }
 0x188   : > { %1493 = vmatpush.msra.mxu0 %v1462_v42 }
 0x18a   : > { %v1219_v11 = vpop.permute.xlu0 %1218  ;;  %v1170_v17 = vpop.permute.xlu1 %1169 }
 0x18b   : > { %v1227_v2 = vadd.f32 %v1219_v11, %v1207_v5  ;;  %v1177_v4 = vadd.f32 %v1170_v17, %v1157_v25  ;;  %v2953_v5 = vstv %s1809_s26  ;;  %v1465_v25 = vld [vmem:[%s3155_s5 + $0x18] sm:$0xff]  ;;  %s1812_s26 = sld [smem:[#allocation9 + $0x18]] }
 0x18c   : > { %v1357_v51 = vmul.f32 %v2953_v5, %v2820_v19  ;;  %v1307_v19 = vmul.f32 %v2946_v47, %v2822_v36  ;;  %1518 = vmatpush.msra.mxu3 %v1465_v25  ;;  %v1565_v25 = vld [vmem:[%s3157_s7 + $0xb8] sm:$0xff] }
 0x18d   : > { %v1247_v50 = vadd.f32 %v1239_v1, %v1227_v2  ;;  %v1192_v61 = vpop.permute.xlu2 %1191 }
 0x18f   : > { %v1258_v34 = vadd.f32 %v1255_v16, %v1247_v50  ;;  %v1257_v50 = vmul.f32 %v2939_v58, %v2839_v35  ;;  %v1358_v35 = vmul.f32 %v2953_v5, %v2868_v44  ;;  %v1557_v44 = vld [vmem:[%s3157_s7 + $0x78] sm:$0xff] }
 0x190   : > { %1582 = vmatpush.msrb.mxu0 %v1557_v44  ;;  %1827 = vmatpush.msra.mxu2 %v1557_v44 }
 0x192   : > { %v1121_v49 = vpop.permute.xlu0 %1120  ;;  %v1190_v41 = vpop.permute.xlu1 %1189 }
 0x193   : > { %v1127_v52 = vadd.f32 %v1121_v49, %v1107_v10  ;;  %v1197_v62 = vadd.f32 %v1190_v41, %v1177_v4  ;;  %v1463_v10 = vld [vmem:[%s3155_s5 + $0x8] sm:$0xff]  ;;  %v2979_v4 = vstv %s1812_s26 }
 0x194   : > { %1519 = vmatpush.msra.mxu3 %v1463_v10 }
 0x195   : > { %v1147_v38 = vadd.f32 %v1141_v14, %v1127_v52  ;;  %v1208_v7 = vadd.f32 %v1205_v46, %v1197_v62  ;;  %v1341_v55 = vpop.permute.xlu2 %1340  ;;  %v1408_v52 = vmul.f32 %v2979_v4, %v2857_v21 }
 0x197   : > { %v1158_v12 = vadd.f32 %v1155_v30, %v1147_v38 }
 0x19a   : > { %v1270_v31 = vpop.permute.xlu0 %1269  ;;  %v1221_v48 = vpop.permute.xlu1 %1220 }
 0x19b   : > { %v1278_v15 = vadd.f32 %v1270_v31, %v1258_v34  ;;  %v1228_v0 = vadd.f32 %v1221_v48, %v1208_v7  ;;  %v1308_v48 = vmul.f32 %v2946_v47, %v2881_v8  ;;  %v1555_v47 = vld [vmem:[%s3157_s7 + $0x68] sm:$0xff] }
 0x19d   : > { %v1298_v43 = vadd.f32 %v1290_v63, %v1278_v15 }
 0x19f   : > { %v1309_v27 = vadd.f32 %v1306_v33, %v1298_v43  ;;  %v1243_v54 = vpop.permute.xlu2 %1242 }
 0x1a2   : > { %v1172_v28 = vpop.permute.xlu0 %1171  ;;  %v1241_v32 = vpop.permute.xlu1 %1240 }
 0x1a3   : > { %v1178_v6 = vadd.f32 %v1172_v28, %v1158_v12  ;;  %v1248_v18 = vadd.f32 %v1241_v32, %v1228_v0  ;;  %v2987_v0 = vstv %s1454_s27 }
 0x1a5   : > { %v1198_v56 = vadd.f32 %v1192_v61, %v1178_v6  ;;  %v1259_v24 = vadd.f32 %v1256_v37, %v1248_v18  ;;  %v1556_v6 = vld [vmem:[%s3157_s7 + $0x70] sm:$0xff]  ;;  %v1571_v18 = vld [vmem:[%s3157_s7 + $0xe8] sm:$0xff]  ;;  %v1570_v37 = vld [vmem:[%s3157_s7 + $0xe0] sm:$0xff] }
 0x1a6   : > { %1583 = vmatpush.msrb.mxu0 %v1556_v6  ;;  %1610 = vmatpush.msra.mxu1 %v1571_v18 }
 0x1a7   : > { %v1209_v40 = vadd.f32 %v1206_v26, %v1198_v56  ;;  %v1392_v17 = vpop.permute.xlu2 %1391  ;;  %1828 = vmatpush.msra.mxu2 %v1556_v6  ;;  %1843 = vmatpush.msrb.mxu3 %v1571_v18 }
 0x1a8   : > { %1584 = vmatpush.msrb.mxu0 %v1555_v47  ;;  %1611 = vmatpush.msra.mxu1 %v1570_v37 }
 0x1a9   : > { %1829 = vmatpush.msra.mxu2 %v1555_v47  ;;  %1844 = vmatpush.msrb.mxu3 %v1570_v37  ;;  %v1533_v37 = vld [vmem:[%s3156_s6 + $0x18] sm:$0xff] }
 0x1aa   : > { %v1321_v20 = vpop.permute.xlu0 %1320  ;;  %v1272_v1 = vpop.permute.xlu1 %1271 }
 0x1ab   : > { %v1329_v3 = vadd.f32 %v1321_v20, %v1309_v27  ;;  %v1279_v13 = vadd.f32 %v1272_v1, %v1259_v24  ;;  %v1554_v20 = vld [vmem:[%s3157_s7 + $0x60] sm:$0xff]  ;;  %v1569_v1 = vld [vmem:[%s3157_s7 + $0xd8] sm:$0xff] }
 0x1ac   : > { %1585 = vmatpush.msrb.mxu0 %v1554_v20  ;;  %1612 = vmatpush.msra.mxu1 %v1569_v1 }
 0x1ad   : > { %v1349_v45 = vadd.f32 %v1341_v55, %v1329_v3  ;;  %1830 = vmatpush.msra.mxu2 %v1554_v20  ;;  %1845 = vmatpush.msrb.mxu3 %v1569_v1  ;;  %v1535_v20 = vld [vmem:[%s3156_s6 + $0x28] sm:$0xff] }
 0x1af   : > { %v1360_v23 = vadd.f32 %v1357_v51, %v1349_v45  ;;  %v1294_v62 = vpop.permute.xlu2 %1293  ;;  %v1409_v45 = vmul.f32 %v2979_v4, %v2900_v60 }
 0x1b2   : > { %v1292_v29 = vpop.permute.xlu1 %1291 }
 0x1b3   : > { %v1299_v9 = vadd.f32 %v1292_v29, %v1279_v13  ;;  %v1568_v13 = vld [vmem:[%s3157_s7 + $0xd0] sm:$0xff] }
 0x1b4   : > { %1613 = vmatpush.msra.mxu1 %v1568_v13  ;;  %1846 = vmatpush.msrb.mxu3 %v1568_v13 }
 0x1b5   : > { %v1310_v14 = vadd.f32 %v1307_v19, %v1299_v9  ;;  %v1550_v19 = vld [vmem:[%s3157_s7 + $0x40] sm:$0xff] }
 0x1b7   : > { %v1223_v11 = vpop.permute.xlu0 %1222  ;;  %v1443_v43 = vpop.permute.xlu2 %1442 }
 0x1b8   : > { %v1229_v36 = vadd.f32 %v1223_v11, %v1209_v40  ;;  %v1549_v11 = vld [vmem:[%s3157_s7 + $0x38] sm:$0xff] }
 0x1ba   : > { %v1249_v2 = vadd.f32 %v1243_v54, %v1229_v36  ;;  %v1359_v54 = vmul.f32 %v2953_v5, %v2902_v57  ;;  %v1567_v57 = vld [vmem:[%s3157_s7 + $0xc8] sm:$0xff]  ;;  %v1564_v36 = vld [vmem:[%s3157_s7 + $0xb0] sm:$0xff] }
 0x1bb   : > { %v1551_v5 = vld [vmem:[%s3157_s7 + $0x48] sm:$0xff]  ;;  %1614 = vmatpush.msra.mxu1 %v1567_v57  ;;  %1847 = vmatpush.msrb.mxu3 %v1567_v57 }
 0x1bc   : > { %v1260_v16 = vadd.f32 %v1257_v50, %v1249_v2  ;;  %v1548_v2 = vld [vmem:[%s3157_s7 + $0x30] sm:$0xff]  ;;  %v1563_v50 = vld [vmem:[%s3157_s7 + $0xa8] sm:$0xff] }
 0x1bd   : > { %1615 = vmatpush.msra.mxu1 %v1566_v53  ;;  %1848 = vmatpush.msrb.mxu3 %v1566_v53 }
 0x1bf   : > { %v1372_v34 = vpop.permute.xlu0 %1371  ;;  %v1345_v56 = vpop.permute.xlu2 %1344  ;;  %1616 = vmatpush.msra.mxu1 %v1565_v25  ;;  %1849 = vmatpush.msrb.mxu3 %v1565_v25 }
 0x1c0   : > { %v1380_v49 = vadd.f32 %v1372_v34, %v1360_v23  ;;  %v1323_v41 = vpop.permute.xlu1 %1322  ;;  %v1553_v23 = vld [vmem:[%s3157_s7 + $0x58] sm:$0xff] }
 0x1c1   : > { %v1330_v38 = vadd.f32 %v1323_v41, %v1310_v14  ;;  %1586 = vmatpush.msrb.mxu0 %v1553_v23  ;;  %1831 = vmatpush.msra.mxu2 %v1553_v23 }
 0x1c2   : > { %v1400_v63 = vadd.f32 %v1392_v17, %v1380_v49  ;;  %1617 = vmatpush.msra.mxu1 %v1564_v36  ;;  %v1547_v49 = vld [vmem:[%s3157_s7 + $0x28] sm:$0xff]  ;;  %1850 = vmatpush.msrb.mxu3 %v1564_v36  ;;  %v1646_v36 = vld [vmem:[%s3158_s8] sm:$0x1] }
 0x1c3   : > { %1587 = vmatpush.msrb.mxu0 %v1552_v39  ;;  %1832 = vmatpush.msra.mxu2 %v1552_v39 }
 0x1c4   : > { %v1411_v46 = vadd.f32 %v1408_v52, %v1400_v63  ;;  %1618 = vmatpush.msra.mxu1 %v1563_v50  ;;  %v1410_v52 = vmul.f32 %v2979_v4, %v2917_v22  ;;  %v1544_v4 = vld [vmem:[%s3157_s7 + $0x10] sm:$0xff]  ;;  %1851 = vmatpush.msrb.mxu3 %v1563_v50 }
 0x1c5   : > { %1588 = vmatpush.msrb.mxu0 %v1551_v5  ;;  %1833 = vmatpush.msra.mxu2 %v1551_v5 }
 0x1c7   : > { %v1274_v7 = vpop.permute.xlu0 %1273  ;;  %v1445_v42 = vpop.permute.xlu2 %1444  ;;  %1589 = vmatpush.msrb.mxu0 %v1550_v19  ;;  %1834 = vmatpush.msra.mxu2 %v1550_v19 }
 0x1c8   : > { %v1280_v30 = vadd.f32 %v1274_v7, %v1260_v16  ;;  %v1343_v12 = vpop.permute.xlu1 %1342 }
 0x1c9   : > { %v1350_v31 = vadd.f32 %v1343_v12, %v1330_v38  ;;  %1590 = vmatpush.msrb.mxu0 %v1549_v11  ;;  %1835 = vmatpush.msra.mxu2 %v1549_v11  ;;  %v1545_v38 = vld [vmem:[%s3157_s7 + $0x18] sm:$0xff] }
 0x1ca   : > { %v1300_v58 = vadd.f32 %v1294_v62, %v1280_v30  ;;  %v1546_v62 = vld [vmem:[%s3157_s7 + $0x20] sm:$0xff] }
 0x1cb   : > { %v1361_v15 = vadd.f32 %v1358_v35, %v1350_v31  ;;  %1591 = vmatpush.msrb.mxu0 %v1548_v2  ;;  %1836 = vmatpush.msra.mxu2 %v1548_v2 }
 0x1cc   : > { %v1311_v61 = vadd.f32 %v1308_v48, %v1300_v58  ;;  %v1543_v58 = vld [vmem:[%s3157_s7 + $0x8] sm:$0xff]  ;;  %v1562_v48 = vld [vmem:[%s3157_s7 + $0xa0] sm:$0xff] }
 0x1cd   : > { %1592 = vmatpush.msrb.mxu0 %v1547_v49  ;;  %1837 = vmatpush.msra.mxu2 %v1547_v49 }
 0x1ce   : > { %1619 = vmatpush.msra.mxu1 %v1562_v48  ;;  %1852 = vmatpush.msrb.mxu3 %v1562_v48 }
 0x1cf   : > { %v1423_v33 = vpop.permute.xlu0 %1422  ;;  %1593 = vmatpush.msrb.mxu0 %v1546_v62  ;;  %v1447_v30 = vpop.permute.xlu2 %1446  ;;  %1838 = vmatpush.msra.mxu2 %v1546_v62 }
 0x1d0   : > { %v1431_v21 = vadd.f32 %v1423_v33, %v1411_v46  ;;  %v1374_v27 = vpop.permute.xlu1 %1373  ;;  %v1559_v33 = vld [vmem:[%s3157_s7 + $0x88] sm:$0xff] }
 0x1d1   : > { %v1381_v24 = vadd.f32 %v1374_v27, %v1361_v15  ;;  %1594 = vmatpush.msrb.mxu0 %v1545_v38  ;;  %1839 = vmatpush.msra.mxu2 %v1545_v38  ;;  %v1542_v15 = vld [vmem:[%s3157_s7] sm:$0xff] }
 0x1d2   : > { %v1451_v28 = vadd.f32 %v1443_v43, %v1431_v21  ;;  %v1560_v43 = vld [vmem:[%s3157_s7 + $0x90] sm:$0xff]  ;;  %v1558_v21 = vld [vmem:[%s3157_s7 + $0x80] sm:$0xff] }
 0x1d3   : > { %1595 = vmatpush.msrb.mxu0 %v1544_v4  ;;  %1840 = vmatpush.msra.mxu2 %v1544_v4  ;;  %v1530_v27 = vld [vmem:[%s3156_s6] sm:$0xff] }
 0x1d4   : > { %v1456_v32 = vadd.f32 %v2987_v0, %v1451_v28 }
 0x1d5   : > { %1596 = vmatpush.msrb.mxu0 %v1543_v58  ;;  %1841 = vmatpush.msra.mxu2 %v1543_v58 }
 0x1d6   : > { %v1459_v8 = vmax.f32 %v1456_v32, 0.0  ;;  %v1531_v32 = vld [vmem:[%s3156_s6 + $0x8] sm:$0xff] }
 0x1d7   : > { %v1325_v26 = vpop.permute.xlu0 %1324  ;;  %1597 = vmatpush.msrb.mxu0 %v1542_v15  ;;  %1842 = vmatpush.msra.mxu2 %v1542_v15 }
 0x1d8   : > { %v1331_v55 = vadd.f32 %v1325_v26, %v1311_v61  ;;  %v1394_v40 = vpop.permute.xlu1 %1393  ;;  %1815 = vmatmul.msk.f32.vlgmr.msra.gmra.mxu0 %vm1468_vm2, %v1459_v8  ;;  %1818 = vmatmul.msk.f32.vlgmr.msra.gmra.mxu3 %vm1468_vm2, %v1459_v8  ;;  %v1561_v61 = vld [vmem:[%s3157_s7 + $0x98] sm:$0xff]  ;;  %v1532_v8 = vld [vmem:[%s3156_s6 + $0x10] sm:$0xff]  ;;  %v1534_v26 = vld [vmem:[%s3156_s6 + $0x20] sm:$0xff] }
 0x1d9   : > { %v1401_v3 = vadd.f32 %v1394_v40, %v1381_v24  ;;  %1620 = vmatpush.msra.mxu1 %v1561_v61  ;;  %1853 = vmatpush.msrb.mxu3 %v1561_v61 }
 0x1da   : > { %v1351_v51 = vadd.f32 %v1345_v56, %v1331_v55 }
 0x1db   : > { %v1412_v29 = vadd.f32 %v1409_v45, %v1401_v3  ;;  %1621 = vmatpush.msra.mxu1 %v1560_v43  ;;  %1854 = vmatpush.msrb.mxu3 %v1560_v43 }
 0x1dc   : > { %v1362_v60 = vadd.f32 %v1359_v54, %v1351_v51 }
 0x1dd   : > { %1622 = vmatpush.msra.mxu1 %v1559_v33  ;;  %1855 = vmatpush.msrb.mxu3 %v1559_v33 }
 0x1df   : > { %v1425_v59 = vpop.permute.xlu0 %1424  ;;  %1623 = vmatpush.msra.mxu1 %v1558_v21  ;;  %1856 = vmatpush.msrb.mxu3 %v1558_v21 }
 0x1e0   : > { %v1432_v9 = vadd.f32 %v1425_v59, %v1412_v29  ;;  %v1376_v10 = vpop.permute.xlu1 %1375 }
 0x1e1   : > { %v1382_v16 = vadd.f32 %v1376_v10, %v1362_v60 }
 0x1e2   : > { %v1452_v14 = vadd.f32 %v1445_v42, %v1432_v9 }
 0x1e4   : > { %v1457_v17 = vadd.f32 %v2987_v0, %v1452_v14 }
 0x1e6   : > { %v1460_v34 = vmax.f32 %v1457_v17, 0.0 }
 0x1e7   : > { %v1396_v41 = vpop.permute.xlu0 %1395 }
 0x1e8   : > { %v1402_v63 = vadd.f32 %v1396_v41, %v1382_v16  ;;  %1816 = vmatmul.msk.f32.gmra.mxu0 %vm1468_vm2, %v1460_v34  ;;  %1819 = vmatmul.msk.f32.gmra.mxu3 %vm1468_vm2, %v1460_v34  ;;  %v1427_v7 = vpop.permute.xlu1 %1426 }
 0x1ea   : > { %v1413_v46 = vadd.f32 %v1410_v52, %v1402_v63 }
 0x1ec   : > { %v1433_v22 = vadd.f32 %v1427_v7, %v1413_v46 }
 0x1ee   : > { %v1453_v12 = vadd.f32 %v1447_v30, %v1433_v22 }
 0x1f0   : > { %v1458_v31 = vadd.f32 %v2987_v0, %v1453_v12 }
 0x1f2   : > { %v1461_v35 = vmax.f32 %v1458_v31, 0.0 }
 0x1f4   : > { %1817 = vmatmul.msk.f32.gmra.mxu0 %vm1468_vm2, %v1461_v35  ;;  %1820 = vmatmul.msk.f32.gmra.mxu3 %vm1468_vm2, %v1461_v35 }
 0x255   : > { %v1495_v0 = vpop.f32.mrf.mxu0 }
 0x256   : > { %v1536_v28 = vmul.f32 %v1530_v27, %v1495_v0 }
 0x258   : > { %1598 = vmatmul.f32.vlgmr.msrb.gmra.mxu0 %v1536_v28 }
 0x25b   : > { %v1521_v44 = vpop.f32.mrf.mxu3 }
 0x25c   : > { %v1537_v6 = vmul.f32 %v1531_v32, %v1521_v44 }
 0x25e   : > { %1821 = vmatmul.msk.f32.vlgmr.msra.gmra.mxu1 %vm1572_vm3, %v1537_v6 }
 0x265   : > { %v1498_v47 = vpop.f32.mrf.mxu0 }
 0x266   : > { %v1538_v18 = vmul.f32 %v1532_v8, %v1498_v47 }
 0x268   : > { %1601 = vmatmul.f32.vlgmr.msra.gmra.mxu2 %v1538_v18 }
 0x26b   : > { %v1524_v56 = vpop.f32.mrf.mxu3 }
 0x26c   : > { %v1539_v24 = vmul.f32 %v1533_v37, %v1524_v56 }
 0x26e   : > { %1822 = vmatmul.msk.f32.gmra.mxu1 %vm1572_vm3, %v1539_v24 }
 0x271   : > { %v1501_v55 = vpop.f32.mrf.mxu0 }
 0x272   : > { %v1540_v40 = vmul.f32 %v1534_v26, %v1501_v55 }
 0x274   : > { %1604 = vmatmul.f32.gmra.mxu2 %v1540_v40 }
 0x277   : > { %v1527_v1 = vpop.f32.mrf.mxu3 }
 0x278   : > { %v1541_v3 = vmul.f32 %v1535_v20, %v1527_v1 }
 0x27a   : > { %1823 = vmatmul.msk.f32.vlgmr.msrb.gmra.mxu3 %vm1572_vm3, %v1541_v3 }
 0x2d5   : > { %v1599_v13 = vpop.f32.mrf.mxu0 }
 0x2db   : > { %v1625_v45 = vpop.f32.mrf.mxu1 }
 0x2dc   : > { %v1626_v29 = vadd.f32 %v1625_v45, %v1599_v13 }
 0x2de   : > { %v1635_v5 = vsel %vm1634_vm4, %v1626_v29, 0.0 }
 0x2eb   : > { %v1602_v51 = vpop.f32.mrf.mxu2  ;;  %v1628_v54 = vpop.f32.mrf.mxu1 }
 0x2ec   : > { %v1629_v23 = vadd.f32 %v1628_v54, %v1602_v51 }
 0x2ee   : > { %v1636_v60 = vsel %vm1634_vm4, %v1629_v23, 0.0 }
 0x2ef   : > { %v1637_v59 = vadd.f32 %v1636_v60, %v1635_v5 }
 0x2f7   : > { %v1605_v39 = vpop.f32.mrf.mxu2 }
 0x2fd   : > { %v1631_v57 = vpop.f32.mrf.mxu3 }
 0x2fe   : > { %v1632_v53 = vadd.f32 %v1631_v57, %v1605_v39 }
 0x300   : > { %v1638_v9 = vsel %vm1634_vm4, %v1632_v53, 0.0 }
 0x301   : > { %v1639_v19 = vadd.f32 %v1638_v9, %v1637_v59 }
 0x303   : > { %v1640_v25 = vrot.slane %v1639_v19, 4 }
 0x305   : > { %v1641_v42 = vadd.f32 %v1640_v25, %v1639_v19 }
 0x307   : > { %v1642_v10 = vrot.slane %v1641_v42, 2 }
 0x309   : > { %v1643_v14 = vadd.f32 %v1642_v10, %v1641_v42 }
 0x30b   : > { %v1644_v11 = vrot.slane %v1643_v14, 1 }
 0x30d   : > { %v1645_v17 = vadd.f32 %v1644_v11, %v1643_v14 }
 0x30f   : > { %v1647_v2 = vadd.f32 %v1646_v36, %v1645_v17 }
 0x311   : > { %1649 = vst.msk [vmem:[%s364_s28] sm:$0x1] %vm1648_vm5, %v1647_v2 }
 0x312   : > { %2001 = shalt.err (!%p1998_p8)
}
 0x313   : > { %1869 = dma.vmem_to_hbm [thread:$0]  (%p2142_p5), %s1662_s29, 16, %s1664_s17, %s1651_s18  }
 0x314 PF: > { %p1891_p9 = scmp.ge.s32.totalorder %s2044_s14, 2  ;;  %s1675_s22 = sand.u32 1, %s2032_s11  }
 0x315   : > { %s1676_s26 = scalar_lea.sflag [#allocation5], %s1675_s22 }
 0x316   : > { %p1882_p10 = pnand %p1891_p9, %p2146_p6 }
 0x318   : > { %p1883_p11 = pneg %p1882_p10 }
 0x31a   : > { %2027 = dma.done.wait (%p1883_p11), %s1676_s26, 16  }
 0x31b   : > { %2029 = vsyncadd (%p1883_p11), %s1676_s26, 4294967280  ;;  %p22_p12 = scmp.ge.s32.totalorder %s2129_s16, 4   ;;  %s3163_s11 = smov %s2036_s12 }
 0x31c   : > { %s3164_s12 = smov %s2040_s13  ;;  %s3165_s13 = smov %s2140_s19 }
 0x31d   : > { %s3166_s14 = smov %s2129_s16  ;;  %24 = sbr.rel (!%p22_p12) target bundleno = 7 (0x7), region = 106 }
 0x322   :  { %1681 = vsyncpa [#allocation5], 1 }
 0x323   :  { %1683 = vsyncpa [#allocation5 + $0x1], 1 }
 0x324   :  { %1684 = vsyncpa [#allocation6], 1 }
 0x325   :  { %1686 = vsyncpa [#allocation6 + $0x1], 1 }
 0x326   :  { %1687 = vsyncpa [#allocation8], 1 }

</bundles_post_ra>
